<compile_context>
chip_gen: v7x
topology: tpu7x:2x2x1
jax: 0.10.0
libtpu: 0.0.40
codegen_flags: <defaults>
</compile_context>

<pallas_src>
import functools

import jax
import jax.numpy as jnp
import numpy as np
from jax.experimental import pallas as pl
from jax.experimental.pallas import tpu as pltpu

_LANE = 128
_BN_EPS = 1e-5


def _conv3x3(xp, w_ref, H, W, Cp):
    """3x3 'same' conv of one spatially padded image tile.

    xp:    (H+2, W+2, Cp) value in the conv dtype (bf16 or f32).
    w_ref: (9, Cp, Cp) ref, tap-major (kh*3+kw), (ci, co) per tap.
    Returns f32 (H*W, Cp) accumulated on the MXU.
    """
    acc = None
    for kh in range(3):
        for kw in range(3):
            xs = xp[kh:kh + H, kw:kw + W, :].reshape(H * W, Cp)
            d = jnp.dot(xs, w_ref[kh * 3 + kw],
                        preferred_element_type=jnp.float32)
            acc = d if acc is None else acc + d
    return acc


def _stats_kernel(xpad_ref, w_ref, sum_ref, sq_ref, *, H, W, Cp):
    """Pass 1: per-channel sum and sum-of-squares of f = conv(x).

    Accumulated across the batch grid axis (output block index constant ->
    block stays resident; init on the first grid step).
    """
    @pl.when(pl.program_id(0) == 0)
    def _():
        sum_ref[...] = jnp.zeros_like(sum_ref)
        sq_ref[...] = jnp.zeros_like(sq_ref)

    f = _conv3x3(xpad_ref[0], w_ref, H, W, Cp)          # (H*W, Cp) f32
    sum_ref[...] += jnp.sum(f, axis=0, keepdims=True)
    sq_ref[...] += jnp.sum(f * f, axis=0, keepdims=True)


def _apply_kernel(xpad_ref, w_ref, scale_ref, shift_ref, rbeta_ref, out_ref,
                  *, H, W, Cp):
    """Pass 2: conv recompute + folded (BN affine * alpha) + ReLU + beta*x.

    Recomputing the conv avoids writing/reading the f32 intermediate f to HBM,
    which is the better trade in this memory-bound regime.
    """
    xp = xpad_ref[0]                                    # (H+2, W+2, Cp)
    f = _conv3x3(xp, w_ref, H, W, Cp)                   # (H*W, Cp) f32
    xres = xp[1:H + 1, 1:W + 1, :].reshape(H * W, Cp).astype(jnp.float32)
    y = jnp.maximum(f * scale_ref[...] + shift_ref[...], 0.0)
    out_ref[0] = y + rbeta_ref[...] * xres


def laurel_block(x_nchw, conv_w, bn_gamma, bn_beta, laurel_w,
                 *, conv_dtype=jnp.bfloat16):
    """Pallas forward of LAuReLBlock. x_nchw: (N, C, H, W); conv_w: (C, C, 3, 3)."""
    N, C, H, W = x_nchw.shape
    Cout, Cin, KH, KW = conv_w.shape
    assert (KH, KW) == (3, 3) and Cin == C and Cout == C
    Hp, Wp = H + 2, W + 2
    Cp = ((C + _LANE - 1) // _LANE) * _LANE     # lane-dense channel padding

    # --- layout glue (minimal: +1 spatial halo, channel zero-pad, bf16 cast).
    # The NCHW<->NHWC transposes are imposed by the module's NCHW contract; a
    # channel-last consumer could drop both and save two full HBM round-trips.
    x_nhwc = jnp.transpose(x_nchw, (0, 2, 3, 1)).astype(jnp.float32)
    xpad = jnp.pad(x_nhwc, ((0, 0), (1, 1), (1, 1), (0, Cp - C)))
    xpad = xpad.astype(conv_dtype)

    # Conv weight (Cout, Cin, 3, 3) -> (9, Cin_p, Cout_p), tap-major, zero-pad.
    w = jnp.transpose(conv_w, (2, 3, 1, 0)).reshape(9, Cin, Cout)
    w = jnp.pad(w.astype(jnp.float32),
                ((0, 0), (0, Cp - Cin), (0, Cp - Cout))).astype(conv_dtype)

    # --- VMEM budget (double-buffered blocks + in-kernel temporaries) ---
    ibytes = jnp.dtype(conv_dtype).itemsize
    est = (2 * Hp * Wp * Cp * ibytes        # double-buffered input tile
           + 2 * 9 * Cp * Cp * ibytes       # conv weights
           + 2 * H * W * Cp * 4             # double-buffered output tile
           + 5 * H * W * Cp * 4             # conv accumulator + tap temporaries
           + (2 << 20))                     # headroom
    if est > (56 << 20):
        # TODO(synk): add H-tiling with a 2-row halo (manual make_async_copy
        # double buffering) once a single padded image exceeds per-core VMEM.
        raise NotImplementedError(
            "per-image tile exceeds the VMEM budget; needs H-halo tiling")
    vmem_limit = int(min(max(est, 32 << 20), 64 << 20))

    img_spec = pl.BlockSpec((1, Hp, Wp, Cp), lambda n: (n, 0, 0, 0))
    w_spec = pl.BlockSpec((9, Cp, Cp), lambda n: (0, 0, 0))
    vec_spec = pl.BlockSpec((1, Cp), lambda n: (0, 0))

    # --- pass 1: batch statistics of f = conv(x) ---
    f_sum, f_sq = pl.pallas_call(
        functools.partial(_stats_kernel, H=H, W=W, Cp=Cp),
        out_shape=(jax.ShapeDtypeStruct((1, Cp), jnp.float32),
                   jax.ShapeDtypeStruct((1, Cp), jnp.float32)),
        grid=(N,),
        in_specs=[img_spec, w_spec],
        out_specs=(vec_spec, vec_spec),
        compiler_params=pltpu.CompilerParams(
            dimension_semantics=("arbitrary",),   # accumulator across batch
            vmem_limit_bytes=vmem_limit),
    )(xpad, w)

    # --- tiny JAX epilogue: fold BN affine and alpha into one scale/shift ---
    M = N * H * W
    mean = f_sum[0] / M
    # var = E[f^2] - mean^2, accumulated in f32; clamp tiny negative residue.
    var = jnp.maximum(f_sq[0] / M - mean * mean, 0.0)
    inv = jax.lax.rsqrt(var + _BN_EPS)
    gamma_p = jnp.pad(bn_gamma.astype(jnp.float32), (0, Cp - C))
    betabn_p = jnp.pad(bn_beta.astype(jnp.float32), (0, Cp - C))
    ab = jax.nn.softmax(laurel_w.astype(jnp.float32))
    alpha, beta = ab[0], ab[1]
    # softmax guarantees alpha > 0, so alpha * ReLU(y) == ReLU(alpha * y).
    g = gamma_p * inv
    scale = (alpha * g).reshape(1, Cp)
    shift = (alpha * (betabn_p - mean * g)).reshape(1, Cp)
    rbeta = jnp.broadcast_to(beta, (1, Cp)).astype(jnp.float32)

    # --- pass 2: conv + folded BN/ReLU + residual combine (lane-dense store) ---
    out = pl.pallas_call(
        functools.partial(_apply_kernel, H=H, W=W, Cp=Cp),
        out_shape=jax.ShapeDtypeStruct((N, H * W, Cp), jnp.float32),
        grid=(N,),
        in_specs=[img_spec, w_spec, vec_spec, vec_spec, vec_spec],
        out_specs=pl.BlockSpec((1, H * W, Cp), lambda n: (n, 0, 0)),
        compiler_params=pltpu.CompilerParams(
            dimension_semantics=("parallel",),    # images are independent
            vmem_limit_bytes=vmem_limit),
    )(xpad, w, scale, shift, rbeta)

    # Back to the module's NCHW contract, dropping the padded channels.
    out = out.reshape(N, H, W, Cp)[..., :C]
    return jnp.transpose(out, (0, 3, 1, 2))


def laurel_block_ref(x_nchw, conv_w, bn_gamma, bn_beta, laurel_w):
    """Pure-JAX reference (same semantics as the PyTorch module in train mode)."""
    f = jax.lax.conv_general_dilated(
        x_nchw.astype(jnp.float32), conv_w.astype(jnp.float32),
        window_strides=(1, 1), padding=((1, 1), (1, 1)),
        dimension_numbers=("NCHW", "OIHW", "NCHW"),
    )
    mean = jnp.mean(f, axis=(0, 2, 3), keepdims=True)
    var = jnp.mean((f - mean) ** 2, axis=(0, 2, 3), keepdims=True)
    f = (f - mean) * jax.lax.rsqrt(var + _BN_EPS)
    f = f * bn_gamma.reshape(1, -1, 1, 1) + bn_beta.reshape(1, -1, 1, 1)
    f = jnp.maximum(f, 0.0)
    ab = jax.nn.softmax(laurel_w.astype(jnp.float32))
    return ab[0] * f + ab[1] * x_nchw.astype(jnp.float32)


if __name__ == "__main__":
    key = jax.random.PRNGKey(0)
    kx, kw = jax.random.split(key)

    N, C, H, W = 2, 4, 16, 16   # in_channels == out_channels (residual add)
    x = jax.random.normal(kx, (N, C, H, W), dtype=jnp.float32)

    # Deterministic parameter init (synthetic, not a checkpoint).
    conv_w = jax.random.normal(kw, (C, C, 3, 3), dtype=jnp.float32) * 0.1
    bn_gamma = jnp.ones((C,), jnp.float32)   # BatchNorm2d default weight
    bn_beta = jnp.zeros((C,), jnp.float32)   # BatchNorm2d default bias
    laurel_w = jnp.ones((2,), jnp.float32)   # nn.Parameter(torch.ones(2))

    ref = jax.block_until_ready(
        laurel_block_ref(x, conv_w, bn_gamma, bn_beta, laurel_w))

    # Exact path (f32 MXU inputs): tight check of the kernel structure.
    out_f32 = jax.block_until_ready(
        laurel_block(x, conv_w, bn_gamma, bn_beta, laurel_w,
                     conv_dtype=jnp.float32))
    np.testing.assert_allclose(np.asarray(out_f32), np.asarray(ref),
                               rtol=1e-3, atol=1e-3)

    # Default perf path (bf16 MXU inputs, f32 accumulation): bf16-class check.
    out_bf16 = jax.block_until_ready(
        laurel_block(x, conv_w, bn_gamma, bn_beta, laurel_w))
    np.testing.assert_allclose(np.asarray(out_bf16), np.asarray(ref),
                               rtol=2e-2, atol=2e-2)

    print("KERNEL_OK")
</pallas_src>

<mosaic_0001>
module attributes {stable_mosaic.version = 11 : i64} {
  func.func @_stats_kernel(%arg0: i32, %arg1: memref<1x18x18x128xf32, #tpu.memory_space<vmem>>, %arg2: memref<9x128x128xf32, #tpu.memory_space<vmem>>, %arg3: memref<1x128xf32, #tpu.memory_space<vmem>>, %arg4: memref<1x128xf32, #tpu.memory_space<vmem>>) attributes {dimension_semantics = [#tpu.dimension_semantics<arbitrary>], iteration_bounds = array<i64: 2>, scalar_prefetch = 0 : i64, scratch_operands = 0 : i64, tpu.core_type = #tpu.core_type<tc>, window_params = [{transform_indices = @transform_0, window_bounds = array<i64: 1, 18, 18, 128>}, {pipeline_mode = #tpu.pipeline_mode<synchronous>, transform_indices = @transform_1, window_bounds = array<i64: 9, 128, 128>}, {pipeline_mode = #tpu.pipeline_mode<synchronous>, transform_indices = @transform_2, window_bounds = array<i64: 1, 128>}, {pipeline_mode = #tpu.pipeline_mode<synchronous>, transform_indices = @transform_3, window_bounds = array<i64: 1, 128>}]} {
    %c0_i32 = arith.constant 0 : i32
    %0 = arith.cmpi eq, %arg0, %c0_i32 : i32
    %1 = arith.extui %0 : i1 to i32
    %c0_i32_0 = arith.constant 0 : i32
    %2 = arith.cmpi ne, %1, %c0_i32_0 : i32
    scf.if %2 {
      %cst_41 = arith.constant 0.000000e+00 : f32
      %69 = vector.broadcast %cst_41 : f32 to vector<1x128xf32>
      %c0_42 = arith.constant 0 : index
      %c0_43 = arith.constant 0 : index
      %70 = vector.load %arg3[%c0_42, %c0_43] : memref<1x128xf32, #tpu.memory_space<vmem>>, vector<1x128xf32>
      tpu.vector_store %arg3[%c0_42, %c0_43], %69 {strides = array<i32>} : memref<1x128xf32, #tpu.memory_space<vmem>>, vector<1x128xf32>,
      %cst_44 = arith.constant 0.000000e+00 : f32
      %71 = vector.broadcast %cst_44 : f32 to vector<1x128xf32>
      %c0_45 = arith.constant 0 : index
      %c0_46 = arith.constant 0 : index
      %72 = vector.load %arg4[%c0_45, %c0_46] : memref<1x128xf32, #tpu.memory_space<vmem>>, vector<1x128xf32>
      tpu.vector_store %arg4[%c0_45, %c0_46], %71 {strides = array<i32>} : memref<1x128xf32, #tpu.memory_space<vmem>>, vector<1x128xf32>,
    } else {
    }
    %c0 = arith.constant 0 : index
    %c0_1 = arith.constant 0 : index
    %c0_2 = arith.constant 0 : index
    %c0_3 = arith.constant 0 : index
    %3 = vector.load %arg1[%c0, %c0_1, %c0_2, %c0_3] : memref<1x18x18x128xf32, #tpu.memory_space<vmem>>, vector<1x18x18x128xf32>
    %4 = vector.shape_cast %3 : vector<1x18x18x128xf32> to vector<18x18x128xf32>
    %5 = vector.extract_strided_slice %4 {offsets = [0, 0, 0], sizes = [16, 16, 128], strides = [1, 1, 1]} : vector<18x18x128xf32> to vector<16x16x128xf32>
    %6 = vector.shape_cast %5 : vector<16x16x128xf32> to vector<256x128xf32>
    %c0_4 = arith.constant 0 : index
    %c0_5 = arith.constant 0 : index
    %c0_6 = arith.constant 0 : index
    %7 = vector.load %arg2[%c0_4, %c0_5, %c0_6] : memref<9x128x128xf32, #tpu.memory_space<vmem>>, vector<1x128x128xf32>
    %8 = vector.shape_cast %7 : vector<1x128x128xf32> to vector<128x128xf32>
    %cst = arith.constant dense<0.000000e+00> : vector<256x128xf32>
    %9 = tpu.matmul %6, %8, %cst {dimension_numbers = #tpu.dot_dimension_numbers<[1], [0], [0], [1], [0, 0, 1, 1], [], []>} : vector<256x128xf32>, vector<128x128xf32>, vector<256x128xf32> -> vector<256x128xf32>
    %10 = vector.extract_strided_slice %4 {offsets = [0, 1, 0], sizes = [16, 16, 128], strides = [1, 1, 1]} : vector<18x18x128xf32> to vector<16x16x128xf32>
    %11 = vector.shape_cast %10 : vector<16x16x128xf32> to vector<256x128xf32>
    %c1 = arith.constant 1 : index
    %c0_7 = arith.constant 0 : index
    %c0_8 = arith.constant 0 : index
    %12 = vector.load %arg2[%c1, %c0_7, %c0_8] : memref<9x128x128xf32, #tpu.memory_space<vmem>>, vector<1x128x128xf32>
    %13 = vector.shape_cast %12 : vector<1x128x128xf32> to vector<128x128xf32>
    %cst_9 = arith.constant dense<0.000000e+00> : vector<256x128xf32>
    %14 = tpu.matmul %11, %13, %cst_9 {dimension_numbers = #tpu.dot_dimension_numbers<[1], [0], [0], [1], [0, 0, 1, 1], [], []>} : vector<256x128xf32>, vector<128x128xf32>, vector<256x128xf32> -> vector<256x128xf32>
    %15 = arith.addf %9, %14 : vector<256x128xf32>
    %16 = vector.extract_strided_slice %4 {offsets = [0, 2, 0], sizes = [16, 16, 128], strides = [1, 1, 1]} : vector<18x18x128xf32> to vector<16x16x128xf32>
    %17 = vector.shape_cast %16 : vector<16x16x128xf32> to vector<256x128xf32>
    %c2 = arith.constant 2 : index
    %c0_10 = arith.constant 0 : index
    %c0_11 = arith.constant 0 : index
    %18 = vector.load %arg2[%c2, %c0_10, %c0_11] : memref<9x128x128xf32, #tpu.memory_space<vmem>>, vector<1x128x128xf32>
    %19 = vector.shape_cast %18 : vector<1x128x128xf32> to vector<128x128xf32>
    %cst_12 = arith.constant dense<0.000000e+00> : vector<256x128xf32>
    %20 = tpu.matmul %17, %19, %cst_12 {dimension_numbers = #tpu.dot_dimension_numbers<[1], [0], [0], [1], [0, 0, 1, 1], [], []>} : vector<256x128xf32>, vector<128x128xf32>, vector<256x128xf32> -> vector<256x128xf32>
    %21 = arith.addf %15, %20 : vector<256x128xf32>
    %22 = vector.extract_strided_slice %4 {offsets = [1, 0, 0], sizes = [16, 16, 128], strides = [1, 1, 1]} : vector<18x18x128xf32> to vector<16x16x128xf32>
    %23 = vector.shape_cast %22 : vector<16x16x128xf32> to vector<256x128xf32>
    %c3 = arith.constant 3 : index
    %c0_13 = arith.constant 0 : index
    %c0_14 = arith.constant 0 : index
    %24 = vector.load %arg2[%c3, %c0_13, %c0_14] : memref<9x128x128xf32, #tpu.memory_space<vmem>>, vector<1x128x128xf32>
    %25 = vector.shape_cast %24 : vector<1x128x128xf32> to vector<128x128xf32>
    %cst_15 = arith.constant dense<0.000000e+00> : vector<256x128xf32>
    %26 = tpu.matmul %23, %25, %cst_15 {dimension_numbers = #tpu.dot_dimension_numbers<[1], [0], [0], [1], [0, 0, 1, 1], [], []>} : vector<256x128xf32>, vector<128x128xf32>, vector<256x128xf32> -> vector<256x128xf32>
    %27 = arith.addf %21, %26 : vector<256x128xf32>
    %28 = vector.extract_strided_slice %4 {offsets = [1, 1, 0], sizes = [16, 16, 128], strides = [1, 1, 1]} : vector<18x18x128xf32> to vector<16x16x128xf32>
    %29 = vector.shape_cast %28 : vector<16x16x128xf32> to vector<256x128xf32>
    %c4 = arith.constant 4 : index
    %c0_16 = arith.constant 0 : index
    %c0_17 = arith.constant 0 : index
    %30 = vector.load %arg2[%c4, %c0_16, %c0_17] : memref<9x128x128xf32, #tpu.memory_space<vmem>>, vector<1x128x128xf32>
    %31 = vector.shape_cast %30 : vector<1x128x128xf32> to vector<128x128xf32>
    %cst_18 = arith.constant dense<0.000000e+00> : vector<256x128xf32>
    %32 = tpu.matmul %29, %31, %cst_18 {dimension_numbers = #tpu.dot_dimension_numbers<[1], [0], [0], [1], [0, 0, 1, 1], [], []>} : vector<256x128xf32>, vector<128x128xf32>, vector<256x128xf32> -> vector<256x128xf32>
    %33 = arith.addf %27, %32 : vector<256x128xf32>
    %34 = vector.extract_strided_slice %4 {offsets = [1, 2, 0], sizes = [16, 16, 128], strides = [1, 1, 1]} : vector<18x18x128xf32> to vector<16x16x128xf32>
    %35 = vector.shape_cast %34 : vector<16x16x128xf32> to vector<256x128xf32>
    %c5 = arith.constant 5 : index
    %c0_19 = arith.constant 0 : index
    %c0_20 = arith.constant 0 : index
    %36 = vector.load %arg2[%c5, %c0_19, %c0_20] : memref<9x128x128xf32, #tpu.memory_space<vmem>>, vector<1x128x128xf32>
    %37 = vector.shape_cast %36 : vector<1x128x128xf32> to vector<128x128xf32>
    %cst_21 = arith.constant dense<0.000000e+00> : vector<256x128xf32>
    %38 = tpu.matmul %35, %37, %cst_21 {dimension_numbers = #tpu.dot_dimension_numbers<[1], [0], [0], [1], [0, 0, 1, 1], [], []>} : vector<256x128xf32>, vector<128x128xf32>, vector<256x128xf32> -> vector<256x128xf32>
    %39 = arith.addf %33, %38 : vector<256x128xf32>
    %40 = vector.extract_strided_slice %4 {offsets = [2, 0, 0], sizes = [16, 16, 128], strides = [1, 1, 1]} : vector<18x18x128xf32> to vector<16x16x128xf32>
    %41 = vector.shape_cast %40 : vector<16x16x128xf32> to vector<256x128xf32>
    %c6 = arith.constant 6 : index
    %c0_22 = arith.constant 0 : index
    %c0_23 = arith.constant 0 : index
    %42 = vector.load %arg2[%c6, %c0_22, %c0_23] : memref<9x128x128xf32, #tpu.memory_space<vmem>>, vector<1x128x128xf32>
    %43 = vector.shape_cast %42 : vector<1x128x128xf32> to vector<128x128xf32>
    %cst_24 = arith.constant dense<0.000000e+00> : vector<256x128xf32>
    %44 = tpu.matmul %41, %43, %cst_24 {dimension_numbers = #tpu.dot_dimension_numbers<[1], [0], [0], [1], [0, 0, 1, 1], [], []>} : vector<256x128xf32>, vector<128x128xf32>, vector<256x128xf32> -> vector<256x128xf32>
    %45 = arith.addf %39, %44 : vector<256x128xf32>
    %46 = vector.extract_strided_slice %4 {offsets = [2, 1, 0], sizes = [16, 16, 128], strides = [1, 1, 1]} : vector<18x18x128xf32> to vector<16x16x128xf32>
    %47 = vector.shape_cast %46 : vector<16x16x128xf32> to vector<256x128xf32>
    %c7 = arith.constant 7 : index
    %c0_25 = arith.constant 0 : index
    %c0_26 = arith.constant 0 : index
    %48 = vector.load %arg2[%c7, %c0_25, %c0_26] : memref<9x128x128xf32, #tpu.memory_space<vmem>>, vector<1x128x128xf32>
    %49 = vector.shape_cast %48 : vector<1x128x128xf32> to vector<128x128xf32>
    %cst_27 = arith.constant dense<0.000000e+00> : vector<256x128xf32>
    %50 = tpu.matmul %47, %49, %cst_27 {dimension_numbers = #tpu.dot_dimension_numbers<[1], [0], [0], [1], [0, 0, 1, 1], [], []>} : vector<256x128xf32>, vector<128x128xf32>, vector<256x128xf32> -> vector<256x128xf32>
    %51 = arith.addf %45, %50 : vector<256x128xf32>
    %52 = vector.extract_strided_slice %4 {offsets = [2, 2, 0], sizes = [16, 16, 128], strides = [1, 1, 1]} : vector<18x18x128xf32> to vector<16x16x128xf32>
    %53 = vector.shape_cast %52 : vector<16x16x128xf32> to vector<256x128xf32>
    %c8 = arith.constant 8 : index
    %c0_28 = arith.constant 0 : index
    %c0_29 = arith.constant 0 : index
    %54 = vector.load %arg2[%c8, %c0_28, %c0_29] : memref<9x128x128xf32, #tpu.memory_space<vmem>>, vector<1x128x128xf32>
    %55 = vector.shape_cast %54 : vector<1x128x128xf32> to vector<128x128xf32>
    %cst_30 = arith.constant dense<0.000000e+00> : vector<256x128xf32>
    %56 = tpu.matmul %53, %55, %cst_30 {dimension_numbers = #tpu.dot_dimension_numbers<[1], [0], [0], [1], [0, 0, 1, 1], [], []>} : vector<256x128xf32>, vector<128x128xf32>, vector<256x128xf32> -> vector<256x128xf32>
    %57 = arith.addf %51, %56 : vector<256x128xf32>
    %c0_31 = arith.constant 0 : index
    %c0_32 = arith.constant 0 : index
    %58 = vector.load %arg3[%c0_31, %c0_32] : memref<1x128xf32, #tpu.memory_space<vmem>>, vector<1x128xf32>
    %cst_33 = arith.constant dense<0.000000e+00> : vector<128xf32>
    %59 = vector.multi_reduction <add>, %57, %cst_33 [0] : vector<256x128xf32> to vector<128xf32>
    %60 = vector.shape_cast %59 : vector<128xf32> to vector<1x128xf32>
    %61 = arith.addf %58, %60 : vector<1x128xf32>
    %c0_34 = arith.constant 0 : index
    %c0_35 = arith.constant 0 : index
    %62 = vector.load %arg3[%c0_34, %c0_35] : memref<1x128xf32, #tpu.memory_space<vmem>>, vector<1x128xf32>
    tpu.vector_store %arg3[%c0_34, %c0_35], %61 {strides = array<i32>} : memref<1x128xf32, #tpu.memory_space<vmem>>, vector<1x128xf32>,
    %c0_36 = arith.constant 0 : index
    %c0_37 = arith.constant 0 : index
    %63 = vector.load %arg4[%c0_36, %c0_37] : memref<1x128xf32, #tpu.memory_space<vmem>>, vector<1x128xf32>
    %64 = arith.mulf %57, %57 : vector<256x128xf32>
    %cst_38 = arith.constant dense<0.000000e+00> : vector<128xf32>
    %65 = vector.multi_reduction <add>, %64, %cst_38 [0] : vector<256x128xf32> to vector<128xf32>
    %66 = vector.shape_cast %65 : vector<128xf32> to vector<1x128xf32>
    %67 = arith.addf %63, %66 : vector<1x128xf32>
    %c0_39 = arith.constant 0 : index
    %c0_40 = arith.constant 0 : index
    %68 = vector.load %arg4[%c0_39, %c0_40] : memref<1x128xf32, #tpu.memory_space<vmem>>, vector<1x128xf32>
    tpu.vector_store %arg4[%c0_39, %c0_40], %67 {strides = array<i32>} : memref<1x128xf32, #tpu.memory_space<vmem>>, vector<1x128xf32>,
    return
  }
  func.func @transform_0(%arg0: i32) -> (i32, i32, i32, i32) {
    %c0_i32 = arith.constant 0 : i32
    %c0_i32_0 = arith.constant 0 : i32
    %c0_i32_1 = arith.constant 0 : i32
    %c0_i32_2 = arith.constant 0 : i32
    return %arg0, %c0_i32, %c0_i32_0, %c0_i32_1 : i32, i32, i32, i32
  }
  func.func @transform_1(%arg0: i32) -> (i32, i32, i32) {
    %c0_i32 = arith.constant 0 : i32
    %c0_i32_0 = arith.constant 0 : i32
    %c0_i32_1 = arith.constant 0 : i32
    %c0_i32_2 = arith.constant 0 : i32
    return %c0_i32, %c0_i32_0, %c0_i32_1 : i32, i32, i32
  }
  func.func @transform_2(%arg0: i32) -> (i32, i32) {
    %c0_i32 = arith.constant 0 : i32
    %c0_i32_0 = arith.constant 0 : i32
    %c0_i32_1 = arith.constant 0 : i32
    return %c0_i32, %c0_i32_0 : i32, i32
  }
  func.func @transform_3(%arg0: i32) -> (i32, i32) {
    %c0_i32 = arith.constant 0 : i32
    %c0_i32_0 = arith.constant 0 : i32
    %c0_i32_1 = arith.constant 0 : i32
    return %c0_i32, %c0_i32_0 : i32, i32
  }
}

</mosaic_0001>

<bundles_post_ra>
// kernel: tpu_custom_call.1
= control target key start
LH: loop header
LB: loop body
LE: loop exit
PB: predicated region body
PF: predicated region fallthrough
CT: control target
= control target key end

     0   :  { %9 = vsyncpa [#allocation3], 0  ;;  %s6426_s0 = inlined_call_operand.vmem [shape: f32[2,18,18,128], index: 0, kind: input, shape index: {}]   ;;  %s6427_s1 = inlined_call_operand.vmem [shape: f32[9,128,128], index: 1, kind: input, shape index: {}]   ;;  %s6428_s2 = inlined_call_operand.hbm [shape: f32[1,128], index: 2, kind: output, shape index: {0}]   ;;  %s6429_s3 = inlined_call_operand.hbm [shape: f32[1,128], index: 3, kind: output, shape index: {1}]  }
   0x1   :  { %10 = vsyncpa [#allocation5], 0  ;;  %s5099_s12 = smov 0  }
   0x2 LB: > { %s5105_s13 = sadd.s32 4294967295, %s5074_s12   ;;  %p3108_p0 = scmp.ge.s32.totalorder %s5074_s12, 1  ;;  %s5074_s12 = sphi %s5099_s12, %s16_s12  }
   0x3   : > { %p132_p1 = scmp.lt.s32.totalorder %s5074_s12, 3 }
   0x5   : > { %p133_p2 = pnand %p3108_p0, %p132_p1 }
   0x7   : > { %136 = sbr.rel (%p133_p2) target bundleno = 615 (0x267), region = 28 }
   0xe   : > { %p151_p3 = scmp.lt.s32.totalorder %s5105_s13, 1  ;;  %p3110_p4 = scmp.ne.s32.totalorder %s5105_s13, 0 }
   0xf   : > { %v5076_v0 = vmov (!%p3110_p4), 0.0  }
  0x10   : > { %s152_s14 = scalar_select %p151_p3, %s5105_s13, 1 }
  0x11   : > { %159 = sbr.rel (%p3110_p4) target bundleno = 24 (0x18), region = 32  ;;  %160 = vst [vmem:[#allocation2] sm:$0x1] (!%p3110_p4), %v5076_v0  ;;  %161 = vst [vmem:[#allocation4] sm:$0x1] (!%p3110_p4), %v5076_v0 }
  0x12   : > { %s4957_s15 = smul.u32 432, %s152_s14 }
  0x14   : > { %s5114_s18 = scalar_lea.vmem %s6426_s0, %s4957_s15 }
  0x18 PF: > { %v3111_v1 = vld [vmem:[%s6427_s1 + $0x80] sm:$0xff]  ;;  %v3112_v2 = vld [vmem:[%s6427_s1 + $0x88] sm:$0xff]  ;;  %v3113_v6 = vld [vmem:[%s6427_s1 + $0x90] sm:$0xff]  ;;  %vm280_vm0 = vcmask 1046528   ;;  %vm860_vm1 = vcmask 1045504   ;;  %p4966_p5 = scmp.eq.s32.totalorder %s5105_s13, 1 }
  0x19   : > { %v3159_v3 = vld [vmem:[%s6427_s1 + $0x200] sm:$0xff]  ;;  %v4397_v4 = vpack.c.bf16 %v3112_v2, %v3111_v1  ;;  %v3160_v5 = vld [vmem:[%s6427_s1 + $0x208] sm:$0xff]  ;;  %v3114_v7 = vld [vmem:[%s6427_s1 + $0x98] sm:$0xff]  ;;  %s5078_s20 = smov [#allocation4]  }
  0x1a   : > { %v5135_v8 = vpack.c.bf16 %v3160_v5, %v3159_v3  ;;  %v4401_v9 = vpack.c.bf16 %v3114_v7, %v3113_v6  ;;  %v3161_v10 = vld [vmem:[%s6427_s1 + $0x210] sm:$0xff]  ;;  %v3162_v11 = vld [vmem:[%s6427_s1 + $0x218] sm:$0xff]  ;;  %v3115_v12 = vld [vmem:[%s6427_s1 + $0xa0] sm:$0xff]  ;;  %s3055_s21 = sshll.u32 %s5078_s20, 4  ;;  %s6371_s21 = int_to_ptr.vmem [resolvable:$true] %s3055_s21 }
  0x1b   : > { %4398 = vmatprep.subr.bf16.mxu1 %v4397_v4  ;;  %v5146_v13 = vpack.c.bf16 %v3162_v11, %v3161_v10  ;;  %v3116_v14 = vld [vmem:[%s6427_s1 + $0xa8] sm:$0xff]  ;;  %v3163_v15 = vld [vmem:[%s6427_s1 + $0x220] sm:$0xff]  ;;  %v3117_v19 = vld [vmem:[%s6427_s1 + $0xb0] sm:$0xff] }
  0x1c   : > { %6512 = vst [vmem:[#allocation8_spill] sm:$0xff] %v5135_v8  ;;  %v3164_v16 = vld [vmem:[%s6427_s1 + $0x228] sm:$0xff]  ;;  %4526 = vmatprep.subr.bf16.mxu0 %v5135_v8  ;;  %4400 = vmatpush3.bf16.msra.mxu1 %v4397_v4  ;;  %v4405_v17 = vpack.c.bf16 %v3116_v14, %v3115_v12  ;;  %v3118_v20 = vld [vmem:[%s6427_s1 + $0xb8] sm:$0xff]  ;;  %v3165_v21 = vld [vmem:[%s6427_s1 + $0x230] sm:$0xff] }
  0x1d   : > { %6513 = vst [vmem:[#allocation9_spill] sm:$0xff] %v5146_v13  ;;  %4528 = vmatpush3.bf16.msra.mxu0 %v5135_v8  ;;  %4402 = vmatprep.subr.bf16.mxu1 %v4401_v9  ;;  %v5160_v18 = vpack.c.bf16 %v3164_v16, %v3163_v15  ;;  %v3166_v22 = vld [vmem:[%s6427_s1 + $0x238] sm:$0xff]  ;;  %v4409_v23 = vpack.c.bf16 %v3118_v20, %v3117_v19  ;;  %v3119_v24 = vld [vmem:[%s6427_s1 + $0xc0] sm:$0xff]  ;;  %v3120_v25 = vld [vmem:[%s6427_s1 + $0xc8] sm:$0xff] }
  0x1e   : > { %4530 = vmatprep.subr.bf16.mxu0 %v5146_v13  ;;  %v5182_v26 = vpack.c.bf16 %v3166_v22, %v3165_v21  ;;  %v3167_v27 = vld [vmem:[%s6427_s1 + $0x240] sm:$0xff]  ;;  %v3168_v28 = vld [vmem:[%s6427_s1 + $0x248] sm:$0xff]  ;;  %v5198_v32 = vld [vmem:[%s5114_s18 + $0x18] sm:$0xff]  ;;  %v4413_v37 = vpack.c.bf16 %v3120_v25, %v3119_v24 }
  0x1f   : > { %6514 = vst [vmem:[#allocation10_spill] sm:$0xff] %v5160_v18  ;;  %v5191_v29 = vld [vmem:[%s5114_s18] sm:$0xff]  ;;  %v5194_v30 = vld [vmem:[%s5114_s18 + $0x8] sm:$0xff]  ;;  %v286_v35 = vrot.slane %v5198_v32, 1  ;;  %v5208_v38 = vpack.c.bf16 %v3168_v28, %v3167_v27  ;;  %v3121_v39 = vld [vmem:[%s6427_s1 + $0xd0] sm:$0xff] }
  0x20   : > { %4404 = vmatpush3.bf16.msra.mxu1 %v4401_v9  ;;  %6515 = vst [vmem:[#allocation11_spill] sm:$0xff] %v5182_v26  ;;  %v281_v31 = vrot.slane %v5191_v29, 1  ;;  %v5201_v33 = vld [vmem:[%s5114_s18 + $0x20] sm:$0xff]  ;;  %v282_v34 = vrot.slane %v5194_v30, 1  ;;  %v3122_v40 = vld [vmem:[%s6427_s1 + $0xd8] sm:$0xff]  ;;  %v3169_v43 = vld [vmem:[%s6427_s1 + $0x250] sm:$0xff] }
  0x21   : > { %4532 = vmatpush3.bf16.msra.mxu0 %v5146_v13  ;;  %4406 = vmatprep.subr.bf16.mxu1 %v4405_v17  ;;  %v287_v36 = vrot.slane %v5201_v33, 1  ;;  %6516 = vst [vmem:[#allocation12_spill] sm:$0xff] %v5208_v38  ;;  %v3170_v44 = vld [vmem:[%s6427_s1 + $0x258] sm:$0xff]  ;;  %v4417_v45 = vpack.c.bf16 %v3122_v40, %v3121_v39  ;;  %v3123_v47 = vld [vmem:[%s6427_s1 + $0xe0] sm:$0xff]  ;;  %v3124_v48 = vld [vmem:[%s6427_s1 + $0xe8] sm:$0xff] }
  0x22   : > { %4534 = vmatprep.subr.bf16.mxu0 %v5160_v18  ;;  %v283_v41 = vsel %vm280_vm0, %v281_v31, %v282_v34  ;;  %v5233_v46 = vpack.c.bf16 %v3170_v44, %v3169_v43  ;;  %v3171_v49 = vld [vmem:[%s6427_s1 + $0x260] sm:$0xff]  ;;  %v3172_v50 = vld [vmem:[%s6427_s1 + $0x268] sm:$0xff]  ;;  %v4421_v51 = vpack.c.bf16 %v3124_v48, %v3123_v47  ;;  %v3125_v53 = vld [vmem:[%s6427_s1 + $0xf0] sm:$0xff] }
  0x23   : > { %v5222_v42 = vsel %vm280_vm0, %v286_v35, %v287_v36  ;;  %3709 = vmatprep.mubr.f32.mxu1 %v283_v41  ;;  %v5249_v52 = vpack.c.bf16 %v3172_v50, %v3171_v49  ;;  %v3126_v54 = vld [vmem:[%s6427_s1 + $0xf8] sm:$0xff]  ;;  %v3173_v55 = vld [vmem:[%s6427_s1 + $0x270] sm:$0xff]  ;;  %v216_v60 = vld [vmem:[%s6427_s1] sm:$0xff] }
  0x24   : > { %4408 = vmatpush3.bf16.msra.mxu1 %v4405_v17  ;;  %4029 = vmatprep.mubr.f32.mxu0 %v5222_v42  ;;  %6517 = vst [vmem:[#allocation13_spill] sm:$0xff] %v5233_v46  ;;  %v3174_v56 = vld [vmem:[%s6427_s1 + $0x278] sm:$0xff]  ;;  %v4425_v57 = vpack.c.bf16 %v3126_v54, %v3125_v53  ;;  %v164_v58 = vld [vmem:[%s5114_s18 + $0x10] sm:$0x3]  ;;  %v217_v61 = vld [vmem:[%s6427_s1 + $0x8] sm:$0xff] }
  0x25   : > { %4536 = vmatpush3.bf16.msra.mxu0 %v5160_v18  ;;  %4410 = vmatprep.subr.bf16.mxu1 %v4409_v23  ;;  %6518 = vst [vmem:[#allocation14_spill] sm:$0xff] %v5249_v52  ;;  %v5266_v59 = vpack.c.bf16 %v3174_v56, %v3173_v55  ;;  %v5275_v62 = vld [vmem:[%s5114_s18 + $0x28] sm:$0x3]  ;;  %v3175_v63 = vld [vmem:[%s6427_s1 + $0x280] sm:$0xff]  ;;  %v284_v1 = vrot.slane %v164_v58, 1  ;;  %v5284_v2 = vld [vmem:[%s5114_s18 + $0x30] sm:$0xff]  ;;  %v4429_v4 = vpack.c.bf16 %v217_v61, %v216_v60 }
  0x26   : > { %4538 = vmatprep.subr.bf16.mxu0 %v5182_v26  ;;  %v3176_v0 = vld [vmem:[%s6427_s1 + $0x288] sm:$0xff]  ;;  %v5287_v3 = vld [vmem:[%s5114_s18 + $0x38] sm:$0xff]  ;;  %v289_v5 = vrot.slane %v5275_v62, 1  ;;  %v5293_v7 = vld [vmem:[%s5114_s18 + $0x40] sm:$0x3]  ;;  %v291_v10 = vrot.slane %v5284_v2, 1 }
  0x27   : > { %6519 = vst [vmem:[#allocation15_spill] sm:$0xff] %v5266_v59  ;;  %v4557_v6 = vpack.c.bf16 %v3176_v0, %v3175_v63  ;;  %v3177_v9 = vld [vmem:[%s6427_s1 + $0x290] sm:$0xff]  ;;  %v292_v11 = vrot.slane %v5287_v3, 1  ;;  %v3178_v12 = vld [vmem:[%s6427_s1 + $0x298] sm:$0xff]  ;;  %v5304_v14 = vld [vmem:[%s5114_s18 + $0x48] sm:$0xff]  ;;  %v285_v16 = vsel %vm280_vm0, %v282_v34, %v284_v1  ;;  %v294_v21 = vrot.slane %v5293_v7, 1 }
  0x28   : > { %4412 = vmatpush3.bf16.msra.mxu1 %v4409_v23  ;;  %v5307_v15 = vld [vmem:[%s5114_s18 + $0x50] sm:$0xff]  ;;  %v219_v19 = vld [vmem:[%s6427_s1 + $0x18] sm:$0xff]  ;;  %v290_v20 = vsel %vm280_vm0, %v287_v36, %v289_v5  ;;  %v4561_v22 = vpack.c.bf16 %v3178_v12, %v3177_v9  ;;  %v296_v23 = vrot.slane %v5304_v14, 1  ;;  %v3179_v27 = vld [vmem:[%s6427_s1 + $0x2a0] sm:$0xff] }
  0x29   : > { %4540 = vmatpush3.bf16.msra.mxu0 %v5182_v26  ;;  %4414 = vmatprep.subr.bf16.mxu1 %v4413_v37  ;;  %v218_v17 = vld [vmem:[%s6427_s1 + $0x10] sm:$0xff]  ;;  %v297_v24 = vrot.slane %v5307_v15, 1  ;;  %v5326_v25 = vld [vmem:[%s5114_s18 + $0x58] sm:$0x3]  ;;  %v5332_v28 = vsel %vm280_vm0, %v291_v10, %v292_v11  ;;  %v3180_v34 = vld [vmem:[%s6427_s1 + $0x2a8] sm:$0xff]  ;;  %v5351_v40 = vsel %vm280_vm0, %v292_v11, %v294_v21  ;;  %v871_v26 = vrot.slane %v5284_v2, 2 }
  0x2a   : > { %4542 = vmatprep.subr.bf16.mxu0 %v5208_v38  ;;  %6520 = vst [vmem:[#allocation16_spill] sm:$0xff] %v5332_v28  ;;  %v4433_v31 = vpack.c.bf16 %v219_v19, %v218_v17  ;;  %v5338_v35 = vld [vmem:[%s5114_s18 + $0x60] sm:$0xff]  ;;  %v5341_v36 = vld [vmem:[%s5114_s18 + $0x68] sm:$0xff]  ;;  %6521 = vst [vmem:[#allocation17_spill] sm:$0xff] %v5351_v40  ;;  %v299_v41 = vrot.slane %v5326_v25, 1  ;;  %v4565_v44 = vpack.c.bf16 %v3180_v34, %v3179_v27 }
  0x2b   : > { %v221_v39 = vld [vmem:[%s6427_s1 + $0x28] sm:$0xff]  ;;  %v5356_v43 = vsel %vm280_vm0, %v296_v23, %v297_v24  ;;  %v302_v47 = vrot.slane %v5341_v36, 1  ;;  %v5361_v48 = vld [vmem:[%s5114_s18 + $0x70] sm:$0x3]  ;;  %v3182_v49 = vld [vmem:[%s6427_s1 + $0x2b8] sm:$0xff] }
  0x2c   : > { %4416 = vmatpush3.bf16.msra.mxu1 %v4413_v37  ;;  %v220_v37 = vld [vmem:[%s6427_s1 + $0x20] sm:$0xff]  ;;  %6522 = vst [vmem:[#allocation18_spill] sm:$0xff] %v5356_v43  ;;  %v5370_v50 = vld [vmem:[%s5114_s18 + $0x78] sm:$0xff]  ;;  %v222_v54 = vld [vmem:[%s6427_s1 + $0x30] sm:$0xff]  ;;  %v5385_v56 = vsel %vm280_vm0, %v297_v24, %v299_v41 }
  0x2d   : > { %4544 = vmatpush3.bf16.msra.mxu0 %v5208_v38  ;;  %4418 = vmatprep.subr.bf16.mxu1 %v4417_v45  ;;  %v4437_v53 = vpack.c.bf16 %v221_v39, %v220_v37  ;;  %v223_v55 = vld [vmem:[%s6427_s1 + $0x38] sm:$0xff]  ;;  %6523 = vst [vmem:[#allocation19_spill] sm:$0xff] %v5385_v56  ;;  %v306_v61 = vrot.slane %v5370_v50, 1  ;;  %v5394_v0 = vld [vmem:[%s5114_s18 + $0x88] sm:$0x3]  ;;  %v3183_v1 = vld [vmem:[%s6427_s1 + $0x2c0] sm:$0xff] }
  0x2e   : > { %4546 = vmatprep.subr.bf16.mxu0 %v5233_v46  ;;  %v5404_v5 = vld [vmem:[%s5114_s18 + $0x90] sm:$0xff]  ;;  %v4441_v9 = vpack.c.bf16 %v223_v55, %v222_v54  ;;  %v224_v10 = vld [vmem:[%s6427_s1 + $0x40] sm:$0xff]  ;;  %v225_v11 = vld [vmem:[%s6427_s1 + $0x48] sm:$0xff] }
  0x2f   : > { %v3185_v23 = vld [vmem:[%s6427_s1 + $0x2d0] sm:$0xff]  ;;  %v3186_v24 = vld [vmem:[%s6427_s1 + $0x2d8] sm:$0xff]  ;;  %v5438_v27 = vld [vmem:[%s5114_s18 + $0xa8] sm:$0xff]  ;;  %v4445_v34 = vpack.c.bf16 %v225_v11, %v224_v10 }
  0x30   : > { %4420 = vmatpush3.bf16.msra.mxu1 %v4417_v45  ;;  %v301_v45 = vrot.slane %v5338_v35, 1  ;;  %v226_v37 = vld [vmem:[%s6427_s1 + $0x50] sm:$0xff]  ;;  %v227_v39 = vld [vmem:[%s6427_s1 + $0x58] sm:$0xff]  ;;  %v3187_v54 = vld [vmem:[%s6427_s1 + $0x2e0] sm:$0xff] }
  0x31   : > { %4548 = vmatpush3.bf16.msra.mxu0 %v5233_v46  ;;  %4422 = vmatprep.subr.bf16.mxu1 %v4421_v51  ;;  %v3188_v55 = vld [vmem:[%s6427_s1 + $0x2e8] sm:$0xff]  ;;  %v5563_v18 = vld [vmem:[%s5114_s18 + $0xf8] sm:$0xff] }
  0x32   : > { %4550 = vmatprep.subr.bf16.mxu0 %v5249_v52  ;;  %v5389_v58 = vsel %vm280_vm0, %v301_v45, %v302_v47  ;;  %v4581_v11 = vpack.c.bf16 %v3188_v55, %v3187_v54  ;;  %v866_v55 = vrot.slane %v5198_v32, 2 }
  0x33   : > { %6524 = vst [vmem:[#allocation20_spill] sm:$0xff] %v5389_v58 }
  0x34   : > { %4424 = vmatpush3.bf16.msra.mxu1 %v4421_v51  ;;  %v5373_v51 = vld [vmem:[%s5114_s18 + $0x80] sm:$0xff] }
  0x35   : > { %4552 = vmatpush3.bf16.msra.mxu0 %v5249_v52  ;;  %4426 = vmatprep.subr.bf16.mxu1 %v4425_v57  ;;  %v307_v63 = vrot.slane %v5373_v51, 1  ;;  %v5552_v52 = vld [vmem:[%s5114_s18 + $0xe8] sm:$0x3] }
  0x36   : > { %4554 = vmatprep.subr.bf16.mxu0 %v5266_v59 }
  0x37   : > { %v5423_v17 = vsel %vm280_vm0, %v306_v61, %v307_v63  ;;  %v4449_v61 = vpack.c.bf16 %v227_v39, %v226_v37  ;;  %v231_v37 = vld [vmem:[%s6427_s1 + $0x78] sm:$0xff] }
  0x38   : > { %4428 = vmatpush3.bf16.msra.mxu1 %v4425_v57  ;;  %v304_v57 = vrot.slane %v5361_v48, 1  ;;  %6526 = vst [vmem:[#allocation22_spill] sm:$0xff] %v5423_v17 }
  0x39   : > { %4556 = vmatpush3.bf16.msra.mxu0 %v5266_v59  ;;  %4430 = vmatprep.subr.bf16.mxu1 %v4429_v4  ;;  %v5527_v59 = vld [vmem:[%s5114_s18 + $0xe0] sm:$0xff] }
  0x3a   : > { %4558 = vmatprep.subr.bf16.mxu0 %v4557_v6  ;;  %v5419_v12 = vsel %vm280_vm0, %v302_v47, %v304_v57  ;;  %v4577_v47 = vpack.c.bf16 %v3186_v24, %v3185_v23  ;;  %v5472_v57 = vld [vmem:[%s5114_s18 + $0xc0] sm:$0xff]  ;;  %v5496_v23 = vld [vmem:[%s5114_s18 + $0xd0] sm:$0x3] }
  0x3b   : > { %3710 = vmatmul.mubr.f32.vlgmr.msra.gmra.mrb[0].mxu1 %v285_v16  ;;  %6525 = vst [vmem:[#allocation21_spill] sm:$0xff] %v5419_v12  ;;  %v309_v16 = vrot.slane %v5394_v0, 1 }
  0x3c   : > { %4030 = vmatmul.mubr.f32.vlgmr.msra.gmra.mrb[0].mxu0 %v290_v20  ;;  %4432 = vmatpush3.bf16.msra.mxu1 %v4429_v4  ;;  %v3184_v4 = vld [vmem:[%s6427_s1 + $0x2c8] sm:$0xff] }
  0x3d   : > { %4560 = vmatpush3.bf16.msra.mxu0 %v4557_v6  ;;  %3712 = vmatprep.mubr.f32.mxu1 %v5222_v42  ;;  %v3181_v42 = vld [vmem:[%s6427_s1 + $0x2b0] sm:$0xff]  ;;  %v5407_v6 = vld [vmem:[%s5114_s18 + $0x98] sm:$0xff]  ;;  %v4573_v19 = vpack.c.bf16 %v3184_v4, %v3183_v1  ;;  %v5453_v41 = vsel %vm280_vm0, %v307_v63, %v309_v16  ;;  %v228_v63 = vld [vmem:[%s6427_s1 + $0x60] sm:$0xff]  ;;  %v321_v16 = vrot.slane %v5472_v57, 1 }
  0x3e   : > { %4032 = vmatprep.mubr.f32.mxu0 %v5332_v28  ;;  %4562 = vmatprep.subr.bf16.mxu0 %v4561_v22  ;;  %v4569_v60 = vpack.c.bf16 %v3182_v49, %v3181_v42  ;;  %v312_v21 = vrot.slane %v5407_v6, 1  ;;  %6527 = vst [vmem:[#allocation23_spill] sm:$0xff] %v5453_v41  ;;  %v316_v42 = vrot.slane %v5438_v27, 1  ;;  %v229_v1 = vld [vmem:[%s6427_s1 + $0x68] sm:$0xff] }
  0x3f   : > { %3713 = vmatmul.mubr.f32.gmra.mrb[2].mxu1 %v290_v20  ;;  %4434 = vmatprep.subr.bf16.mxu1 %v4433_v31  ;;  %v311_v20 = vrot.slane %v5404_v5, 1  ;;  %v4453_v24 = vpack.c.bf16 %v229_v1, %v228_v63  ;;  %v867_v63 = vrot.slane %v5201_v33, 2  ;;  %v5524_v1 = vld [vmem:[%s5114_s18 + $0xd8] sm:$0xff] }
  0x40   : > { %4033 = vmatmul.mubr.f32.gmra.mrb[2].mxu0 %v5351_v40  ;;  %3715 = vmatprep.mubr.f32.mxu1 %v5332_v28  ;;  %v5700_v28 = vld [vmem:[%s5114_s18 + $0x148] sm:$0x3] }
  0x41   : > { %4564 = vmatpush3.bf16.msra.mxu0 %v4561_v22  ;;  %4035 = vmatprep.mubr.f32.mxu0 %v5356_v43  ;;  %v5428_v22 = vld [vmem:[%s5114_s18 + $0xa0] sm:$0x3]  ;;  %v5457_v45 = vsel %vm280_vm0, %v311_v20, %v312_v21  ;;  %v5555_v46 = vsel %vm860_vm1, %v866_v55, %v867_v63 }
  0x42   : > { %4566 = vmatprep.subr.bf16.mxu0 %v4565_v44  ;;  %4436 = vmatpush3.bf16.msra.mxu1 %v4433_v31  ;;  %v5441_v31 = vld [vmem:[%s5114_s18 + $0xb0] sm:$0xff]  ;;  %6528 = vst [vmem:[#allocation24_spill] sm:$0xff] %v5457_v45 }
  0x43   : > { %3716 = vmatmul.mubr.f32.gmra.mrb[4].mxu1 %v5351_v40  ;;  %4438 = vmatprep.subr.bf16.mxu1 %v4437_v53  ;;  %v317_v49 = vrot.slane %v5441_v31, 1  ;;  %v889_v40 = vrot.slane %v5394_v0, 2 }
  0x44   : > { %4036 = vmatmul.mubr.f32.gmra.mrb[4].mxu0 %v5385_v56  ;;  %3718 = vmatprep.mubr.f32.mxu1 %v5356_v43 }
  0x45   : > { %4568 = vmatpush3.bf16.msra.mxu0 %v4565_v44  ;;  %4038 = vmatprep.mubr.f32.mxu0 %v5389_v58  ;;  %v314_v44 = vrot.slane %v5428_v22, 1  ;;  %v5491_v10 = vsel %vm280_vm0, %v316_v42, %v317_v49 }
  0x46   : > { %4570 = vmatprep.subr.bf16.mxu0 %v4569_v60  ;;  %4440 = vmatpush3.bf16.msra.mxu1 %v4437_v53  ;;  %v5462_v53 = vld [vmem:[%s5114_s18 + $0xb8] sm:$0x3]  ;;  %6530 = vst [vmem:[#allocation26_spill] sm:$0xff] %v5491_v10 }
  0x47   : > { %3719 = vmatmul.mubr.f32.gmra.mrb[6].mxu1 %v5385_v56  ;;  %4442 = vmatprep.subr.bf16.mxu1 %v4441_v9  ;;  %v5487_v4 = vsel %vm280_vm0, %v312_v21, %v314_v44  ;;  %v3190_v21 = vld [vmem:[%s6427_s1 + $0x2f8] sm:$0xff]  ;;  %v324_v44 = vrot.slane %v5496_v23, 1  ;;  %v5663_v56 = vld [vmem:[%s5114_s18 + $0x130] sm:$0x3] }
  0x48   : > { %4039 = vmatmul.mubr.f32.gmra.mrb[6].mxu0 %v5419_v12  ;;  %3721 = vmatprep.mubr.f32.mxu1 %v5389_v58  ;;  %6529 = vst [vmem:[#allocation25_spill] sm:$0xff] %v5487_v4 }
  0x49   : > { %4572 = vmatpush3.bf16.msra.mxu0 %v4569_v60  ;;  %4041 = vmatprep.mubr.f32.mxu0 %v5423_v17  ;;  %v5475_v60 = vld [vmem:[%s5114_s18 + $0xc8] sm:$0xff] }
  0x4a   : > { %4574 = vmatprep.subr.bf16.mxu0 %v4573_v19  ;;  %4444 = vmatpush3.bf16.msra.mxu1 %v4441_v9  ;;  %v319_v9 = vrot.slane %v5462_v53, 1  ;;  %v322_v20 = vrot.slane %v5475_v60, 1 }
  0x4b   : > { %3722 = vmatmul.mubr.f32.gmra.mrb[8].mxu1 %v5419_v12  ;;  %4446 = vmatprep.subr.bf16.mxu1 %v4445_v34 }
  0x4c   : > { %4042 = vmatmul.mubr.f32.gmra.mrb[8].mxu0 %v5453_v41  ;;  %3724 = vmatprep.mubr.f32.mxu1 %v5423_v17  ;;  %v5515_v39 = vsel %vm280_vm0, %v317_v49, %v319_v9  ;;  %v5519_v42 = vsel %vm280_vm0, %v321_v16, %v322_v20  ;;  %v3192_v49 = vld [vmem:[%s6427_s1 + $0x308] sm:$0xff] }
  0x4d   : > { %4576 = vmatpush3.bf16.msra.mxu0 %v4573_v19  ;;  %4044 = vmatprep.mubr.f32.mxu0 %v5457_v45  ;;  %v3189_v19 = vld [vmem:[%s6427_s1 + $0x2f0] sm:$0xff]  ;;  %6531 = vst [vmem:[#allocation27_spill] sm:$0xff] %v5515_v39  ;;  %6532 = vst [vmem:[#allocation28_spill] sm:$0xff] %v5519_v42  ;;  %v3128_v16 = vld [vmem:[%s6427_s1 + $0x108] sm:$0xff] }
  0x4e   : > { %4578 = vmatprep.subr.bf16.mxu0 %v4577_v47  ;;  %4448 = vmatpush3.bf16.msra.mxu1 %v4445_v34  ;;  %v230_v34 = vld [vmem:[%s6427_s1 + $0x70] sm:$0xff]  ;;  %v4585_v54 = vpack.c.bf16 %v3190_v21, %v3189_v19  ;;  %v869_v19 = vrot.slane %v5275_v62, 2  ;;  %v5547_v21 = vsel %vm280_vm0, %v322_v20, %v324_v44  ;;  %v872_v62 = vrot.slane %v5287_v3, 2  ;;  %v3194_v44 = vld [vmem:[%s6427_s1 + $0x318] sm:$0xff] }
  0x4f   : > { %3725 = vmatmul.mubr.f32.gmra.mrb[10].mxu1 %v5453_v41  ;;  %4450 = vmatprep.subr.bf16.mxu1 %v4449_v61  ;;  %v4457_v9 = vpack.c.bf16 %v231_v37, %v230_v34  ;;  %6533 = vst [vmem:[#allocation29_spill] sm:$0xff] %v5547_v21  ;;  %v326_v34 = vrot.slane %v5524_v1, 1  ;;  %v327_v37 = vrot.slane %v5527_v59, 1  ;;  %v3193_v20 = vld [vmem:[%s6427_s1 + $0x310] sm:$0xff]  ;;  %v5626_v41 = vld [vmem:[%s5114_s18 + $0x118] sm:$0x3] }
  0x50   : > { %4045 = vmatmul.mubr.f32.gmra.mrb[10].mxu0 %v5487_v4  ;;  %3727 = vmatprep.mubr.f32.mxu1 %v5457_v45 }
  0x51   : > { %4580 = vmatpush3.bf16.msra.mxu0 %v4577_v47  ;;  %4047 = vmatprep.mubr.f32.mxu0 %v5491_v10  ;;  %v3191_v47 = vld [vmem:[%s6427_s1 + $0x300] sm:$0xff]  ;;  %v5583_v13 = vsel %vm280_vm0, %v326_v34, %v327_v37 }
  0x52   : > { %4582 = vmatprep.subr.bf16.mxu0 %v4581_v11  ;;  %4452 = vmatpush3.bf16.msra.mxu1 %v4449_v61  ;;  %v3127_v61 = vld [vmem:[%s6427_s1 + $0x100] sm:$0xff]  ;;  %v4589_v38 = vpack.c.bf16 %v3192_v49, %v3191_v47  ;;  %v874_v47 = vrot.slane %v5293_v7, 2  ;;  %v5580_v49 = vsel %vm860_vm1, %v867_v63, %v869_v19  ;;  %6534 = vst [vmem:[#allocation30_spill] sm:$0xff] %v5583_v13  ;;  %v876_v7 = vrot.slane %v5304_v14, 2  ;;  %v5596_v63 = vld [vmem:[%s5114_s18 + $0x108] sm:$0xff]  ;;  %v5599_v19 = vld [vmem:[%s5114_s18 + $0x110] sm:$0xff] }
  0x53   : > { %3728 = vmatmul.mubr.f32.gmra.mrb[12].mxu1 %v5487_v4  ;;  %4454 = vmatprep.subr.bf16.mxu1 %v4453_v24  ;;  %v5572_v55 = vpack.c.bf16 %v3128_v16, %v3127_v61  ;;  %v332_v16 = vrot.slane %v5563_v18, 1  ;;  %v3195_v34 = vld [vmem:[%s6427_s1 + $0x320] sm:$0xff]  ;;  %v879_v4 = vrot.slane %v5326_v25, 2  ;;  %v336_v45 = vrot.slane %v5596_v63, 1 }
  0x54   : > { %4048 = vmatmul.mubr.f32.gmra.mrb[12].mxu0 %v5515_v39  ;;  %3730 = vmatprep.mubr.f32.mxu1 %v5491_v10  ;;  %v4593_v10 = vpack.c.bf16 %v3194_v44, %v3193_v20  ;;  %v5615_v20 = vsel %vm860_vm1, %v872_v62, %v874_v47  ;;  %v5637_v47 = vld [vmem:[%s5114_s18 + $0x128] sm:$0xff] }
  0x55   : > { %4584 = vmatpush3.bf16.msra.mxu0 %v4581_v11  ;;  %4050 = vmatprep.mubr.f32.mxu0 %v5519_v42  ;;  %v5560_v11 = vld [vmem:[%s5114_s18 + $0xf0] sm:$0xff]  ;;  %6537 = vst [vmem:[#allocation33_spill] sm:$0xff] %v5615_v20 }
  0x56   : > { %4586 = vmatprep.subr.bf16.mxu0 %v4585_v54  ;;  %4456 = vmatpush3.bf16.msra.mxu1 %v4453_v24  ;;  %v329_v24 = vrot.slane %v5552_v52, 1  ;;  %v331_v61 = vrot.slane %v5560_v11, 1 }
  0x57   : > { %3731 = vmatmul.mubr.f32.gmra.mrb[14].mxu1 %v5515_v39  ;;  %4458 = vmatprep.subr.bf16.mxu1 %v4457_v9  ;;  %v5588_v39 = vld [vmem:[%s5114_s18 + $0x100] sm:$0x3] }
  0x58   : > { %4051 = vmatmul.mubr.f32.gmra.mrb[14].mxu0 %v5547_v21  ;;  %3733 = vmatprep.mubr.f32.mxu1 %v5519_v42  ;;  %v5591_v42 = vsel %vm860_vm1, %v871_v26, %v872_v62  ;;  %v3196_v26 = vld [vmem:[%s6427_s1 + $0x328] sm:$0xff]  ;;  %v334_v44 = vrot.slane %v5588_v39, 1  ;;  %v881_v62 = vrot.slane %v5338_v35, 2 }
  0x59   : > { %4588 = vmatpush3.bf16.msra.mxu0 %v4585_v54  ;;  %4109 = vmatprep.mubr.f32.mxu0 %v5555_v46  ;;  %6535 = vst [vmem:[#allocation31_spill] sm:$0xff] %v5591_v42  ;;  %v877_v54 = vrot.slane %v5307_v15, 2  ;;  %v4597_v25 = vpack.c.bf16 %v3196_v26, %v3195_v34  ;;  %v339_v34 = vrot.slane %v5626_v41, 1  ;;  %v884_v26 = vrot.slane %v5361_v48, 2 }
  0x5a   : > { %4590 = vmatprep.subr.bf16.mxu0 %v4589_v38  ;;  %4460 = vmatpush3.bf16.msra.mxu1 %v4457_v9  ;;  %v5612_v9 = vsel %vm280_vm0, %v327_v37, %v329_v24  ;;  %v5634_v24 = vld [vmem:[%s5114_s18 + $0x120] sm:$0xff]  ;;  %v5649_v17 = vsel %vm280_vm0, %v332_v16, %v334_v44  ;;  %v886_v48 = vrot.slane %v5370_v50, 2  ;;  %v887_v44 = vrot.slane %v5373_v51, 2 }
  0x5b   : > { %3734 = vmatmul.mubr.f32.gmra.mrb[16].mxu1 %v5547_v21  ;;  %4462 = vmatprep.subr.bf16.mxu1 %v5572_v55  ;;  %6536 = vst [vmem:[#allocation32_spill] sm:$0xff] %v5612_v9  ;;  %v5620_v21 = vsel %vm280_vm0, %v331_v61, %v332_v16  ;;  %v5629_v37 = vsel %vm860_vm1, %v876_v7, %v877_v54  ;;  %v3197_v61 = vld [vmem:[%s6427_s1 + $0x330] sm:$0xff]  ;;  %v3198_v7 = vld [vmem:[%s6427_s1 + $0x338] sm:$0xff]  ;;  %6540 = vst [vmem:[#allocation36_spill] sm:$0xff] %v5649_v17  ;;  %v341_v58 = vrot.slane %v5634_v24, 1 }
  0x5c   : > { %4110 = vmatmul.mubr.f32.vlgmr.msra.gmra.mrb[0].mxu0 %v5580_v49  ;;  %3736 = vmatprep.mubr.f32.mxu1 %v5583_v13  ;;  %6538 = vst [vmem:[#allocation34_spill] sm:$0xff] %v5620_v21  ;;  %v337_v13 = vrot.slane %v5599_v19, 1  ;;  %6539 = vst [vmem:[#allocation35_spill] sm:$0xff] %v5629_v37 }
  0x5d   : > { %4592 = vmatpush3.bf16.msra.mxu0 %v4589_v38  ;;  %4112 = vmatprep.mubr.f32.mxu0 %v5591_v42  ;;  %v882_v38 = vrot.slane %v5341_v36, 2 }
  0x5e   : > { %4594 = vmatprep.subr.bf16.mxu0 %v4593_v10  ;;  %v5658_v12 = vsel %vm280_vm0, %v336_v45, %v337_v13  ;;  %v4601_v45 = vpack.c.bf16 %v3198_v7, %v3197_v61  ;;  %v5686_v43 = vsel %vm280_vm0, %v337_v13, %v339_v34  ;;  %v344_v7 = vrot.slane %v5663_v56, 1 }
  0x5f   : > { %3737 = vmatmul.mubr.f32.gmra.mrb[18].mxu1 %v5612_v9  ;;  %v5655_v9 = vsel %vm860_vm1, %v877_v54, %v879_v4  ;;  %6542 = vst [vmem:[#allocation38_spill] sm:$0xff] %v5658_v12  ;;  %v5666_v16 = vsel %vm860_vm1, %v881_v62, %v882_v38  ;;  %v5671_v4 = vld [vmem:[%s5114_s18 + $0x138] sm:$0xff]  ;;  %v3199_v54 = vld [vmem:[%s6427_s1 + $0x340] sm:$0xff]  ;;  %v3200_v62 = vld [vmem:[%s6427_s1 + $0x348] sm:$0xff]  ;;  %v5689_v61 = vsel %vm860_vm1, %v882_v38, %v884_v26  ;;  %v891_v38 = vrot.slane %v5404_v5, 2 }
  0x60   : > { %4113 = vmatmul.mubr.f32.gmra.mrb[2].mxu0 %v5615_v20  ;;  %3739 = vmatprep.mubr.f32.mxu1 %v5620_v21  ;;  %6541 = vst [vmem:[#allocation37_spill] sm:$0xff] %v5655_v9  ;;  %v342_v21 = vrot.slane %v5637_v47, 1  ;;  %6543 = vst [vmem:[#allocation39_spill] sm:$0xff] %v5666_v16  ;;  %v346_v8 = vrot.slane %v5671_v4, 1  ;;  %v5703_v13 = vsel %vm860_vm1, %v886_v48, %v887_v44  ;;  %v892_v34 = vrot.slane %v5407_v6, 2  ;;  %v5708_v26 = vld [vmem:[%s5114_s18 + $0x150] sm:$0xff] }
  0x61   : > { %4115 = vmatprep.mubr.f32.mxu0 %v5629_v37  ;;  %4596 = vmatpush3.bf16.msra.mxu0 %v4593_v10  ;;  %v5674_v10 = vld [vmem:[%s5114_s18 + $0x140] sm:$0xff]  ;;  %6544 = vst [vmem:[#allocation40_spill] sm:$0xff] %v5686_v43  ;;  %6545 = vst [vmem:[#allocation41_spill] sm:$0xff] %v5689_v61  ;;  %v4605_v0 = vpack.c.bf16 %v3200_v62, %v3199_v54  ;;  %v3202_v48 = vld [vmem:[%s6427_s1 + $0x358] sm:$0xff]  ;;  %v349_v54 = vrot.slane %v5700_v28, 1  ;;  %v894_v62 = vrot.slane %v5428_v22, 2 }
  0x62   : > { %4598 = vmatprep.subr.bf16.mxu0 %v4597_v25  ;;  %6547 = vst [vmem:[#allocation43_spill] sm:$0xff] %v5703_v13  ;;  %v896_v22 = vrot.slane %v5438_v27, 2 }
  0x63   : > { %3740 = vmatmul.mubr.f32.gmra.mrb[20].mxu1 %v5649_v17  ;;  %v5694_v17 = vsel %vm280_vm0, %v341_v58, %v342_v21  ;;  %v5711_v58 = vld [vmem:[%s5114_s18 + $0x158] sm:$0xff]  ;;  %v5763_v20 = vsel %vm860_vm1, %v892_v34, %v894_v62 }
  0x64   : > { %4116 = vmatmul.mubr.f32.gmra.mrb[4].mxu0 %v5655_v9  ;;  %3742 = vmatprep.mubr.f32.mxu1 %v5658_v12  ;;  %6546 = vst [vmem:[#allocation42_spill] sm:$0xff] %v5694_v17  ;;  %v347_v12 = vrot.slane %v5674_v10, 1  ;;  %v352_v37 = vrot.slane %v5711_v58, 1  ;;  %6552 = vst [vmem:[#allocation48_spill] sm:$0xff] %v5763_v20 }
  0x65   : > { %4118 = vmatprep.mubr.f32.mxu0 %v5666_v16  ;;  %4600 = vmatpush3.bf16.msra.mxu0 %v4597_v25  ;;  %v3201_v25 = vld [vmem:[%s6427_s1 + $0x350] sm:$0xff]  ;;  %v5723_v16 = vsel %vm280_vm0, %v342_v21, %v344_v7  ;;  %v5740_v21 = vsel %vm860_vm1, %v891_v38, %v892_v34  ;;  %v897_v7 = vrot.slane %v5441_v31, 2  ;;  %v901_v34 = vrot.slane %v5472_v57, 2 }
  0x66   : > { %4602 = vmatprep.subr.bf16.mxu0 %v4601_v45  ;;  %6548 = vst [vmem:[#allocation44_spill] sm:$0xff] %v5723_v16  ;;  %v5732_v9 = vsel %vm280_vm0, %v346_v8, %v347_v12  ;;  %v4609_v8 = vpack.c.bf16 %v3202_v48, %v3201_v25  ;;  %v5760_v38 = vsel %vm280_vm0, %v347_v12, %v349_v54  ;;  %v902_v54 = vrot.slane %v5475_v60, 2 }
  0x67   : > { %3743 = vmatmul.mubr.f32.gmra.mrb[22].mxu1 %v5686_v43  ;;  %v5729_v43 = vsel %vm860_vm1, %v887_v44, %v889_v40  ;;  %6550 = vst [vmem:[#allocation46_spill] sm:$0xff] %v5732_v9  ;;  %v5748_v40 = vld [vmem:[%s5114_s18 + $0x170] sm:$0xff]  ;;  %v3203_v44 = vld [vmem:[%s6427_s1 + $0x360] sm:$0xff]  ;;  %6551 = vst [vmem:[#allocation47_spill] sm:$0xff] %v5760_v38  ;;  %v5777_v12 = vsel %vm860_vm1, %v896_v22, %v897_v7 }
  0x68   : > { %4119 = vmatmul.mubr.f32.gmra.mrb[6].mxu0 %v5689_v61  ;;  %3745 = vmatprep.mubr.f32.mxu1 %v5694_v17  ;;  %6549 = vst [vmem:[#allocation45_spill] sm:$0xff] %v5729_v43  ;;  %v351_v61 = vrot.slane %v5708_v26, 1  ;;  %v5737_v17 = vld [vmem:[%s5114_s18 + $0x160] sm:$0x3] }
  0x69   : > { %4121 = vmatprep.mubr.f32.mxu0 %v5703_v13  ;;  %4604 = vmatpush3.bf16.msra.mxu0 %v4601_v45  ;;  %v5745_v13 = vld [vmem:[%s5114_s18 + $0x168] sm:$0xff]  ;;  %v354_v25 = vrot.slane %v5737_v17, 1 }
  0x6a   : > { %4606 = vmatprep.subr.bf16.mxu0 %v4605_v0  ;;  %v3204_v45 = vld [vmem:[%s6427_s1 + $0x368] sm:$0xff]  ;;  %v5768_v48 = vsel %vm280_vm0, %v351_v61, %v352_v37  ;;  %v356_v42 = vrot.slane %v5745_v13, 1  ;;  %v3206_v61 = vld [vmem:[%s6427_s1 + $0x378] sm:$0xff] }
  0x6b   : > { %3746 = vmatmul.mubr.f32.gmra.mrb[24].mxu1 %v5723_v16  ;;  %6553 = vst [vmem:[#allocation49_spill] sm:$0xff] %v5768_v48  ;;  %v899_v16 = vrot.slane %v5462_v53, 2  ;;  %v4613_v62 = vpack.c.bf16 %v3204_v45, %v3203_v44  ;;  %v3205_v53 = vld [vmem:[%s6427_s1 + $0x370] sm:$0xff] }
  0x6c   : > { %4122 = vmatmul.mubr.f32.gmra.mrb[8].mxu0 %v5729_v43  ;;  %3748 = vmatprep.mubr.f32.mxu1 %v5732_v9  ;;  %v357_v43 = vrot.slane %v5748_v40, 1  ;;  %v5774_v9 = vld [vmem:[%s5114_s18 + $0x178] sm:$0x3] }
  0x6d   : > { %4124 = vmatprep.mubr.f32.mxu0 %v5740_v21  ;;  %4608 = vmatpush3.bf16.msra.mxu0 %v4605_v0  ;;  %v5791_v0 = vsel %vm280_vm0, %v352_v37, %v354_v25  ;;  %v359_v22 = vrot.slane %v5774_v9, 1  ;;  %v5796_v44 = vsel %vm860_vm1, %v897_v7, %v899_v16  ;;  %v907_v37 = vrot.slane %v5527_v59, 2  ;;  %v3207_v16 = vld [vmem:[%s6427_s1 + $0x380] sm:$0xff] }
  0x6e   : > { %4610 = vmatprep.subr.bf16.mxu0 %v4609_v8  ;;  %6554 = vst [vmem:[#allocation50_spill] sm:$0xff] %v5791_v0  ;;  %v5799_v45 = vsel %vm280_vm0, %v356_v42, %v357_v43  ;;  %v4617_v25 = vpack.c.bf16 %v3206_v61, %v3205_v53  ;;  %v911_v53 = vrot.slane %v5560_v11, 2  ;;  %v912_v61 = vrot.slane %v5563_v18, 2 }
  0x6f   : > { %3749 = vmatmul.mubr.f32.gmra.mrb[26].mxu1 %v5760_v38  ;;  %6555 = vst [vmem:[#allocation51_spill] sm:$0xff] %v5799_v45  ;;  %v904_v38 = vrot.slane %v5496_v23, 2  ;;  %v3208_v23 = vld [vmem:[%s6427_s1 + $0x388] sm:$0xff]  ;;  %v5817_v42 = vsel %vm280_vm0, %v357_v43, %v359_v22  ;;  %v3129_v43 = vld [vmem:[%s6427_s1 + $0x110] sm:$0xff]  ;;  %v917_v22 = vrot.slane %v5599_v19, 2 }
  0x70   : > { %4125 = vmatmul.mubr.f32.gmra.mrb[10].mxu0 %v5763_v20  ;;  %3751 = vmatprep.mubr.f32.mxu1 %v5768_v48  ;;  %v5803_v20 = vsel %vm860_vm1, %v901_v34, %v902_v54  ;;  %v906_v48 = vrot.slane %v5524_v1, 2  ;;  %6556 = vst [vmem:[#allocation52_spill] sm:$0xff] %v5817_v42 }
  0x71   : > { %4127 = vmatprep.mubr.f32.mxu0 %v5777_v12  ;;  %4612 = vmatpush3.bf16.msra.mxu0 %v4609_v8  ;;  %v5821_v7 = vsel %vm860_vm1, %v902_v54, %v904_v38  ;;  %v909_v8 = vrot.slane %v5552_v52, 2  ;;  %v3130_v52 = vld [vmem:[%s6427_s1 + $0x118] sm:$0xff]  ;;  %v5846_v54 = vsel %vm860_vm1, %v911_v53, %v912_v61 }
  0x72   : > { %4614 = vmatprep.subr.bf16.mxu0 %v4613_v62  ;;  %v5825_v34 = vsel %vm860_vm1, %v906_v48, %v907_v37  ;;  %v914_v48 = vrot.slane %v5588_v39, 2  ;;  %v3132_v39 = vld [vmem:[%s6427_s1 + $0x128] sm:$0xff] }
  0x73   : > { %3752 = vmatmul.mubr.f32.gmra.mrb[28].mxu1 %v5791_v0  ;;  %v5842_v38 = vsel %vm860_vm1, %v907_v37, %v909_v8  ;;  %v922_v8 = vrot.slane %v5637_v47, 2  ;;  %v5954_v0 = vld [vmem:[%s5114_s18 + $0x190] sm:$0x3] }
  0x74   : > { %4128 = vmatmul.mubr.f32.gmra.mrb[12].mxu0 %v5796_v44  ;;  %3754 = vmatprep.mubr.f32.mxu1 %v5799_v45  ;;  %v5829_v45 = vpack.c.bf16 %v3208_v23, %v3207_v16  ;;  %v4465_v16 = vpack.c.bf16 %v3130_v52, %v3129_v43  ;;  %v5863_v37 = vsel %vm860_vm1, %v912_v61, %v914_v48  ;;  %v921_v23 = vrot.slane %v5634_v24, 2 }
  0x75   : > { %4130 = vmatprep.mubr.f32.mxu0 %v5803_v20  ;;  %4616 = vmatpush3.bf16.msra.mxu0 %v4613_v62  ;;  %v916_v62 = vrot.slane %v5596_v63, 2  ;;  %v926_v43 = vrot.slane %v5671_v4, 2  ;;  %v927_v52 = vrot.slane %v5674_v10, 2 }
  0x76   : > { %4618 = vmatprep.subr.bf16.mxu0 %v4617_v25  ;;  %v5886_v61 = vsel %vm860_vm1, %v921_v23, %v922_v8 }
  0x77   : > { %3755 = vmatmul.mubr.f32.gmra.mrb[30].mxu1 %v5817_v42  ;;  %v5933_v42 = vld [vmem:[%s5114_s18 + $0x188] sm:$0xff] }
  0x78   : > { %4131 = vmatmul.mubr.f32.gmra.mrb[14].mxu0 %v5821_v7  ;;  %3789 = vmatprep.mubr.f32.mxu1 %v5191_v29  ;;  %v3131_v29 = vld [vmem:[%s6427_s1 + $0x120] sm:$0xff] }
  0x79   : > { %4133 = vmatprep.mubr.f32.mxu0 %v5825_v34  ;;  %4620 = vmatpush3.bf16.msra.mxu0 %v4617_v25  ;;  %v5867_v25 = vsel %vm860_vm1, %v916_v62, %v917_v22  ;;  %v4469_v53 = vpack.c.bf16 %v3132_v39, %v3131_v29  ;;  %v3135_v62 = vld [vmem:[%s6427_s1 + $0x140] sm:$0xff]  ;;  %v5905_v29 = vsel %vm860_vm1, %v926_v43, %v927_v52  ;;  %v931_v39 = vrot.slane %v5708_v26, 2 }
  0x7a   : > { %4622 = vmatprep.subr.bf16.mxu0 %v5829_v45  ;;  %v937_v43 = vrot.slane %v5748_v40, 2 }
  0x7b   : > { %3790 = vmatmul.mubr.f32.vlgmr.msra.gmra.mrb[0].mxu1 %v5194_v30  ;;  %v919_v30 = vrot.slane %v5626_v41, 2 }
  0x7c   : > { %4134 = vmatmul.mubr.f32.gmra.mrb[16].mxu0 %v5842_v38  ;;  %4464 = vmatpush3.bf16.msra.mxu1 %v5572_v55  ;;  %v3134_v55 = vld [vmem:[%s6427_s1 + $0x138] sm:$0xff] }
  0x7d   : > { %3792 = vmatprep.mubr.f32.mxu1 %v5198_v32  ;;  %4136 = vmatprep.mubr.f32.mxu0 %v5846_v54  ;;  %v3133_v32 = vld [vmem:[%s6427_s1 + $0x130] sm:$0xff]  ;;  %v5882_v41 = vsel %vm860_vm1, %v917_v22, %v919_v30  ;;  %v3136_v22 = vld [vmem:[%s6427_s1 + $0x148] sm:$0xff]  ;;  %v932_v30 = vrot.slane %v5711_v58, 2 }
  0x7e   : > { %4466 = vmatprep.subr.bf16.mxu1 %v4465_v16  ;;  %v4473_v48 = vpack.c.bf16 %v3134_v55, %v3133_v32  ;;  %v4477_v23 = vpack.c.bf16 %v3136_v22, %v3135_v62  ;;  %v934_v32 = vrot.slane %v5737_v17, 2  ;;  %v5929_v62 = vld [vmem:[%s5114_s18 + $0x180] sm:$0xff] }
  0x7f   : > { %3793 = vmatmul.mubr.f32.gmra.mrb[2].mxu1 %v5201_v33  ;;  %v924_v33 = vrot.slane %v5663_v56, 2  ;;  %v5924_v55 = vsel %vm860_vm1, %v931_v39, %v932_v30  ;;  %v3139_v17 = vld [vmem:[%s6427_s1 + $0x160] sm:$0xff] }
  0x80   : > { %4137 = vmatmul.mubr.f32.gmra.mrb[18].mxu0 %v5863_v37  ;;  %3795 = vmatprep.mubr.f32.mxu1 %v5284_v2 }
  0x81   : > { %4139 = vmatprep.mubr.f32.mxu0 %v5867_v25  ;;  %4468 = vmatpush3.bf16.msra.mxu1 %v4465_v16  ;;  %v5901_v56 = vsel %vm860_vm1, %v922_v8, %v924_v33  ;;  %v929_v16 = vrot.slane %v5700_v28, 2  ;;  %v3137_v8 = vld [vmem:[%s6427_s1 + $0x150] sm:$0xff]  ;;  %v3138_v28 = vld [vmem:[%s6427_s1 + $0x158] sm:$0xff]  ;;  %v936_v33 = vrot.slane %v5745_v13, 2 }
  0x82   : > { %4470 = vmatprep.subr.bf16.mxu1 %v4469_v53  ;;  %v4481_v22 = vpack.c.bf16 %v3138_v28, %v3137_v8  ;;  %v1805_v8 = vrot.slane %v5929_v62, 2  ;;  %v1806_v28 = vrot.slane %v5933_v42, 2 }
  0x83   : > { %3796 = vmatmul.mubr.f32.gmra.mrb[4].mxu1 %v5287_v3  ;;  %v5949_v39 = vsel %vm860_vm1, %v936_v33, %v937_v43 }
  0x84   : > { %4140 = vmatmul.mubr.f32.gmra.mrb[20].mxu0 %v5882_v41  ;;  %3798 = vmatprep.mubr.f32.mxu1 %v5304_v14  ;;  %6558 = vst [vmem:[#allocation54_spill] sm:$0xff] %v5949_v39  ;;  %v5971_v33 = vsel %vm860_vm1, %v1805_v8, %v1806_v28  ;;  %v3210_v8 = vld [vmem:[%s6427_s1 + $0x398] sm:$0xff] }
  0x85   : > { %4142 = vmatprep.mubr.f32.mxu0 %v5886_v61  ;;  %4472 = vmatpush3.bf16.msra.mxu1 %v4469_v53  ;;  %v5920_v53 = vsel %vm860_vm1, %v927_v52, %v929_v16  ;;  %v3140_v52 = vld [vmem:[%s6427_s1 + $0x168] sm:$0xff]  ;;  %v939_v16 = vrot.slane %v5774_v9, 2  ;;  %v3142_v9 = vld [vmem:[%s6427_s1 + $0x178] sm:$0xff]  ;;  %6559 = vst [vmem:[#allocation55_spill] sm:$0xff] %v5971_v33 }
  0x86   : > { %4474 = vmatprep.subr.bf16.mxu1 %v4473_v48  ;;  %6557 = vst [vmem:[#allocation53_spill] sm:$0xff] %v5920_v53 }
  0x87   : > { %3799 = vmatmul.mubr.f32.gmra.mrb[6].mxu1 %v5307_v15 }
  0x88   : > { %4143 = vmatmul.mubr.f32.gmra.mrb[22].mxu0 %v5901_v56  ;;  %3801 = vmatprep.mubr.f32.mxu1 %v5338_v35 }
  0x89   : > { %4145 = vmatprep.mubr.f32.mxu0 %v5905_v29  ;;  %4476 = vmatpush3.bf16.msra.mxu1 %v4473_v48  ;;  %v5945_v48 = vsel %vm860_vm1, %v932_v30, %v934_v32  ;;  %v3141_v30 = vld [vmem:[%s6427_s1 + $0x170] sm:$0xff]  ;;  %v1808_v32 = vrot.slane %v5954_v0, 2 }
  0x8a   : > { %4478 = vmatprep.subr.bf16.mxu1 %v4477_v23 }
  0x8b   : > { %3802 = vmatmul.mubr.f32.gmra.mrb[8].mxu1 %v5341_v36 }
  0x8c   : > { %4146 = vmatmul.mubr.f32.gmra.mrb[24].mxu0 %v5920_v53  ;;  %3804 = vmatprep.mubr.f32.mxu1 %v5370_v50  ;;  %v4485_v53 = vpack.c.bf16 %v3140_v52, %v3139_v17  ;;  %v4489_v17 = vpack.c.bf16 %v3142_v9, %v3141_v30  ;;  %v3143_v52 = vld [vmem:[%s6427_s1 + $0x180] sm:$0xff]  ;;  %v3213_v30 = vld [vmem:[%s6427_s1 + $0x3b0] sm:$0xff]  ;;  %v3214_v9 = vld [vmem:[%s6427_s1 + $0x3b8] sm:$0xff] }
  0x8d   : > { %4148 = vmatprep.mubr.f32.mxu0 %v5924_v55  ;;  %4480 = vmatpush3.bf16.msra.mxu1 %v4477_v23  ;;  %v5967_v23 = vsel %vm860_vm1, %v937_v43, %v939_v16  ;;  %v5984_v43 = vsel %vm860_vm1, %v1806_v28, %v1808_v32  ;;  %v3209_v16 = vld [vmem:[%s6427_s1 + $0x390] sm:$0xff]  ;;  %v3212_v28 = vld [vmem:[%s6427_s1 + $0x3a8] sm:$0xff]  ;;  %v3218_v32 = vld [vmem:[%s6427_s1 + $0x3d8] sm:$0xff] }
  0x8e   : > { %4482 = vmatprep.subr.bf16.mxu1 %v4481_v22  ;;  %6560 = vst [vmem:[#allocation56_spill] sm:$0xff] %v5984_v43 }
  0x8f   : > { %3805 = vmatmul.mubr.f32.gmra.mrb[10].mxu1 %v5373_v51 }
  0x90   : > { %4149 = vmatmul.mubr.f32.gmra.mrb[26].mxu0 %v5945_v48  ;;  %3807 = vmatprep.mubr.f32.mxu1 %v5404_v5 }
  0x91   : > { %4151 = vmatprep.mubr.f32.mxu0 %v5949_v39  ;;  %4484 = vmatpush3.bf16.msra.mxu1 %v4481_v22  ;;  %v3144_v39 = vld [vmem:[%s6427_s1 + $0x188] sm:$0xff] }
  0x92   : > { %4486 = vmatprep.subr.bf16.mxu1 %v4485_v53  ;;  %v5986_v22 = vpack.c.bf16 %v3144_v39, %v3143_v52  ;;  %v3211_v39 = vld [vmem:[%s6427_s1 + $0x3a0] sm:$0xff]  ;;  %v3222_v52 = vld [vmem:[%s6427_s1 + $0x3f8] sm:$0xff] }
  0x93   : > { %3808 = vmatmul.mubr.f32.gmra.mrb[12].mxu1 %v5407_v6 }
  0x94   : > { %4152 = vmatmul.mubr.f32.gmra.mrb[28].mxu0 %v5967_v23  ;;  %3810 = vmatprep.mubr.f32.mxu1 %v5438_v27 }
  0x95   : > { %4154 = vmatprep.mubr.f32.mxu0 %v5971_v33  ;;  %4488 = vmatpush3.bf16.msra.mxu1 %v4485_v53  ;;  %v4625_v53 = vpack.c.bf16 %v3210_v8, %v3209_v16  ;;  %v4982_v16 = vld [vmem:[%s5114_s18 + $0x8] sm:$0xff] }
  0x96   : > { %4490 = vmatprep.subr.bf16.mxu1 %v4489_v17  ;;  %v862_v8 = vrot.slane %v4982_v16, 2  ;;  %v3157_v16 = vld [vmem:[%s6427_s1 + $0x1f0] sm:$0xff] }
  0x97   : > { %3811 = vmatmul.mubr.f32.gmra.mrb[14].mxu1 %v5441_v31 }
  0x98   : > { %4155 = vmatmul.mubr.f32.gmra.mrb[30].mxu0 %v5984_v43  ;;  %3813 = vmatprep.mubr.f32.mxu1 %v5472_v57  ;;  %v6605_v43 = vld [vmem:[#allocation52_spill] sm:$0xff] }
  0x99   : > { %4189 = vmatprep.mubr.f32.mxu0 %v5284_v2  ;;  %4492 = vmatpush3.bf16.msra.mxu1 %v4489_v17  ;;  %v4629_v2 = vpack.c.bf16 %v3212_v28, %v3211_v39  ;;  %v3220_v17 = vld [vmem:[%s6427_s1 + $0x3e8] sm:$0xff]  ;;  %v3223_v39 = vld [vmem:[%s6427_s1 + $0x400] sm:$0xff]  ;;  %v4983_v28 = vld [vmem:[%s5114_s18 + $0x10] sm:$0x3] }
  0x9a   : > { %4494 = vmatprep.subr.bf16.mxu1 %v5986_v22 }
  0x9b   : > { %3814 = vmatmul.mubr.f32.gmra.mrb[16].mxu1 %v5475_v60 }
  0x9c   : > { %4190 = vmatmul.mubr.f32.vlgmr.msra.gmra.mrb[0].mxu0 %v5287_v3  ;;  %3816 = vmatprep.mubr.f32.mxu1 %v5524_v1  ;;  %v4633_v3 = vpack.c.bf16 %v3214_v9, %v3213_v30  ;;  %v3145_v9 = vld [vmem:[%s6427_s1 + $0x190] sm:$0xff] }
  0x9d   : > { %4624 = vmatpush3.bf16.msra.mxu0 %v5829_v45  ;;  %4192 = vmatprep.mubr.f32.mxu0 %v5304_v14  ;;  %v3215_v14 = vld [vmem:[%s6427_s1 + $0x3c0] sm:$0xff]  ;;  %v3216_v45 = vld [vmem:[%s6427_s1 + $0x3c8] sm:$0xff] }
  0x9e   : > { %4626 = vmatprep.subr.bf16.mxu0 %v4625_v53 }
  0x9f   : > { %3817 = vmatmul.mubr.f32.gmra.mrb[18].mxu1 %v5527_v59 }
  0xa0   : > { %4193 = vmatmul.mubr.f32.gmra.mrb[2].mxu0 %v5307_v15  ;;  %3819 = vmatprep.mubr.f32.mxu1 %v5560_v11  ;;  %v4637_v15 = vpack.c.bf16 %v3216_v45, %v3215_v14  ;;  %v3147_v14 = vld [vmem:[%s6427_s1 + $0x1a0] sm:$0xff]  ;;  %v3148_v45 = vld [vmem:[%s6427_s1 + $0x1a8] sm:$0xff] }
  0xa1   : > { %4195 = vmatprep.mubr.f32.mxu0 %v5338_v35  ;;  %4628 = vmatpush3.bf16.msra.mxu0 %v4625_v53  ;;  %v3217_v35 = vld [vmem:[%s6427_s1 + $0x3d0] sm:$0xff] }
  0xa2   : > { %4630 = vmatprep.subr.bf16.mxu0 %v4629_v2 }
  0xa3   : > { %3820 = vmatmul.mubr.f32.gmra.mrb[20].mxu1 %v5563_v18 }
  0xa4   : > { %4196 = vmatmul.mubr.f32.gmra.mrb[4].mxu0 %v5341_v36  ;;  %3822 = vmatprep.mubr.f32.mxu1 %v5596_v63  ;;  %v4641_v36 = vpack.c.bf16 %v3218_v32, %v3217_v35  ;;  %v6564_v35 = vld [vmem:[#allocation37_spill] sm:$0xff] }
  0xa5   : > { %4198 = vmatprep.mubr.f32.mxu0 %v5370_v50  ;;  %4632 = vmatpush3.bf16.msra.mxu0 %v4629_v2  ;;  %v3219_v50 = vld [vmem:[%s6427_s1 + $0x3e0] sm:$0xff]  ;;  %v864_v2 = vrot.slane %v4983_v28, 2  ;;  %v3153_v32 = vld [vmem:[%s6427_s1 + $0x1d0] sm:$0xff] }
  0xa6   : > { %4634 = vmatprep.subr.bf16.mxu0 %v4633_v3  ;;  %v6155_v28 = vld [vmem:[%s5114_s18 + $0x1a0] sm:$0xff] }
  0xa7   : > { %3823 = vmatmul.mubr.f32.gmra.mrb[22].mxu1 %v5599_v19 }
  0xa8   : > { %4199 = vmatmul.mubr.f32.gmra.mrb[6].mxu0 %v5373_v51  ;;  %3825 = vmatprep.mubr.f32.mxu1 %v5634_v24  ;;  %v4645_v51 = vpack.c.bf16 %v3220_v17, %v3219_v50  ;;  %v6566_v17 = vld [vmem:[#allocation41_spill] sm:$0xff] }
  0xa9   : > { %4201 = vmatprep.mubr.f32.mxu0 %v5404_v5  ;;  %4636 = vmatpush3.bf16.msra.mxu0 %v4633_v3  ;;  %v3221_v5 = vld [vmem:[%s6427_s1 + $0x3f0] sm:$0xff] }
  0xaa   : > { %4638 = vmatprep.subr.bf16.mxu0 %v4637_v15  ;;  %v4649_v53 = vpack.c.bf16 %v3222_v52, %v3221_v5  ;;  %v3156_v5 = vld [vmem:[%s6427_s1 + $0x1e8] sm:$0xff]  ;;  %v6567_v52 = vld [vmem:[#allocation43_spill] sm:$0xff] }
  0xab   : > { %3826 = vmatmul.mubr.f32.gmra.mrb[24].mxu1 %v5637_v47 }
  0xac   : > { %4202 = vmatmul.mubr.f32.gmra.mrb[8].mxu0 %v5407_v6  ;;  %3828 = vmatprep.mubr.f32.mxu1 %v5671_v4  ;;  %v4981_v6 = vld [vmem:[%s5114_s18] sm:$0xff] }
  0xad   : > { %4204 = vmatprep.mubr.f32.mxu0 %v5438_v27  ;;  %4640 = vmatpush3.bf16.msra.mxu0 %v4637_v15  ;;  %v861_v27 = vrot.slane %v4981_v6, 2  ;;  %v3150_v15 = vld [vmem:[%s6427_s1 + $0x1b8] sm:$0xff] }
  0xae   : > { %4642 = vmatprep.subr.bf16.mxu0 %v4641_v36 }
  0xaf   : > { %3829 = vmatmul.mubr.f32.gmra.mrb[26].mxu1 %v5674_v10 }
  0xb0   : > { %4205 = vmatmul.mubr.f32.gmra.mrb[10].mxu0 %v5441_v31  ;;  %3831 = vmatprep.mubr.f32.mxu1 %v5708_v26  ;;  %v3224_v31 = vld [vmem:[%s6427_s1 + $0x408] sm:$0xff] }
  0xb1   : > { %4207 = vmatprep.mubr.f32.mxu0 %v5472_v57  ;;  %4644 = vmatpush3.bf16.msra.mxu0 %v4641_v36  ;;  %v863_v57 = vsel %vm860_vm1, %v861_v27, %v862_v8  ;;  %v6074_v30 = vpack.c.bf16 %v3224_v31, %v3223_v39  ;;  %v3154_v36 = vld [vmem:[%s6427_s1 + $0x1d8] sm:$0xff]  ;;  %v6568_v27 = vld [vmem:[#allocation45_spill] sm:$0xff]  ;;  %v6569_v31 = vld [vmem:[#allocation48_spill] sm:$0xff] }
  0xb2   : > { %4646 = vmatprep.subr.bf16.mxu0 %v4645_v51  ;;  %v4513_v50 = vpack.c.bf16 %v3154_v36, %v3153_v32  ;;  %v3232_v32 = vld [vmem:[%s6427_s1 + $0x448] sm:$0xff] }
  0xb3   : > { %3832 = vmatmul.mubr.f32.gmra.mrb[28].mxu1 %v5711_v58  ;;  %v6576_v36 = vld [vmem:[#allocation21_spill] sm:$0xff] }
  0xb4   : > { %4208 = vmatmul.mubr.f32.gmra.mrb[12].mxu0 %v5475_v60  ;;  %3834 = vmatprep.mubr.f32.mxu1 %v5745_v13  ;;  %v3146_v60 = vld [vmem:[%s6427_s1 + $0x198] sm:$0xff] }
  0xb5   : > { %4210 = vmatprep.mubr.f32.mxu0 %v5524_v1  ;;  %4648 = vmatpush3.bf16.msra.mxu0 %v4645_v51  ;;  %v865_v1 = vsel %vm860_vm1, %v862_v8, %v864_v2  ;;  %v4497_v3 = vpack.c.bf16 %v3146_v60, %v3145_v9  ;;  %v3155_v51 = vld [vmem:[%s6427_s1 + $0x1e0] sm:$0xff]  ;;  %v3158_v8 = vld [vmem:[%s6427_s1 + $0x1f8] sm:$0xff]  ;;  %v3225_v2 = vld [vmem:[%s6427_s1 + $0x410] sm:$0xff] }
  0xb6   : > { %4650 = vmatprep.subr.bf16.mxu0 %v4649_v53  ;;  %v4517_v6 = vpack.c.bf16 %v3156_v5, %v3155_v51  ;;  %v4521_v39 = vpack.c.bf16 %v3158_v8, %v3157_v16  ;;  %v6570_v9 = vld [vmem:[#allocation16_spill] sm:$0xff]  ;;  %v3233_v5 = vld [vmem:[%s6427_s1 + $0x450] sm:$0xff]  ;;  %v6578_v16 = vld [vmem:[#allocation23_spill] sm:$0xff] }
  0xb7   : > { %3835 = vmatmul.mubr.f32.gmra.mrb[30].mxu1 %v5748_v40  ;;  %v6579_v8 = vld [vmem:[#allocation24_spill] sm:$0xff] }
  0xb8   : > { %4211 = vmatmul.mubr.f32.gmra.mrb[14].mxu0 %v5527_v59  ;;  %3869 = vmatprep.mubr.f32.mxu1 %v863_v57  ;;  %v4501_v59 = vpack.c.bf16 %v3148_v45, %v3147_v14  ;;  %v3226_v57 = vld [vmem:[%s6427_s1 + $0x418] sm:$0xff]  ;;  %v3228_v14 = vld [vmem:[%s6427_s1 + $0x428] sm:$0xff] }
  0xb9   : > { %4213 = vmatprep.mubr.f32.mxu0 %v5560_v11  ;;  %4652 = vmatpush3.bf16.msra.mxu0 %v4649_v53  ;;  %v3149_v11 = vld [vmem:[%s6427_s1 + $0x1b0] sm:$0xff]  ;;  %v6148_v53 = vld [vmem:[%s5114_s18 + $0x198] sm:$0xff]  ;;  %v4657_v60 = vpack.c.bf16 %v3226_v57, %v3225_v2  ;;  %v3235_v2 = vld [vmem:[%s6427_s1 + $0x460] sm:$0xff] }
  0xba   : > { %4654 = vmatprep.subr.bf16.mxu0 %v6074_v30  ;;  %v6572_v45 = vld [vmem:[#allocation17_spill] sm:$0xff] }
  0xbb   : > { %3870 = vmatmul.mubr.f32.vlgmr.msra.gmra.mrb[0].mxu1 %v865_v1  ;;  %v6571_v1 = vld [vmem:[#allocation8_spill] sm:$0xff] }
  0xbc   : > { %4214 = vmatmul.mubr.f32.gmra.mrb[16].mxu0 %v5563_v18  ;;  %4496 = vmatpush3.bf16.msra.mxu1 %v5986_v22  ;;  %v6561_v18 = vld [vmem:[#allocation31_spill] sm:$0xff]  ;;  %v3152_v22 = vld [vmem:[%s6427_s1 + $0x1c8] sm:$0xff] }
  0xbd   : > { %3872 = vmatprep.mubr.f32.mxu1 %v5555_v46  ;;  %4216 = vmatprep.mubr.f32.mxu0 %v5596_v63  ;;  %v4505_v46 = vpack.c.bf16 %v3150_v15, %v3149_v11  ;;  %v6562_v63 = vld [vmem:[#allocation33_spill] sm:$0xff] }
  0xbe   : > { %4498 = vmatprep.subr.bf16.mxu1 %v4497_v3  ;;  %v3229_v15 = vld [vmem:[%s6427_s1 + $0x430] sm:$0xff]  ;;  %v3236_v57 = vld [vmem:[%s6427_s1 + $0x468] sm:$0xff] }
  0xbf   : > { %3873 = vmatmul.mubr.f32.gmra.mrb[2].mxu1 %v5580_v49  ;;  %v3151_v49 = vld [vmem:[%s6427_s1 + $0x1c0] sm:$0xff] }
  0xc0   : > { %4217 = vmatmul.mubr.f32.gmra.mrb[18].mxu0 %v5599_v19  ;;  %3875 = vmatprep.mubr.f32.mxu1 %v6561_v18  ;;  %v6563_v19 = vld [vmem:[#allocation35_spill] sm:$0xff] }
  0xc1   : > { %4219 = vmatprep.mubr.f32.mxu0 %v5634_v24  ;;  %4500 = vmatpush3.bf16.msra.mxu1 %v4497_v3  ;;  %v4509_v24 = vpack.c.bf16 %v3152_v22, %v3151_v49  ;;  %v3227_v3 = vld [vmem:[%s6427_s1 + $0x420] sm:$0xff] }
  0xc2   : > { %4502 = vmatprep.subr.bf16.mxu1 %v4501_v59  ;;  %v4661_v11 = vpack.c.bf16 %v3228_v14, %v3227_v3  ;;  %v6574_v49 = vld [vmem:[#allocation19_spill] sm:$0xff]  ;;  %v6575_v22 = vld [vmem:[#allocation20_spill] sm:$0xff]  ;;  %v4677_v3 = vpack.c.bf16 %v3236_v57, %v3235_v2  ;;  %v6582_v14 = vld [vmem:[#allocation53_spill] sm:$0xff] }
  0xc3   : > { %3876 = vmatmul.mubr.f32.gmra.mrb[4].mxu1 %v6562_v63  ;;  %v4988_v2 = vld [vmem:[%s5114_s18 + $0x48] sm:$0xff]  ;;  %v6594_v57 = vld [vmem:[#allocation42_spill] sm:$0xff] }
  0xc4   : > { %4220 = vmatmul.mubr.f32.gmra.mrb[20].mxu0 %v5637_v47  ;;  %3878 = vmatprep.mubr.f32.mxu1 %v6563_v19  ;;  %v6565_v47 = vld [vmem:[#allocation39_spill] sm:$0xff] }
  0xc5   : > { %4222 = vmatprep.mubr.f32.mxu0 %v5671_v4  ;;  %4504 = vmatpush3.bf16.msra.mxu1 %v4501_v59  ;;  %v6573_v59 = vld [vmem:[#allocation18_spill] sm:$0xff] }
  0xc6   : > { %4506 = vmatprep.subr.bf16.mxu1 %v4505_v46 }
  0xc7   : > { %3879 = vmatmul.mubr.f32.gmra.mrb[6].mxu1 %v6564_v35 }
  0xc8   : > { %4223 = vmatmul.mubr.f32.gmra.mrb[22].mxu0 %v5674_v10  ;;  %3881 = vmatprep.mubr.f32.mxu1 %v6565_v47 }
  0xc9   : > { %4225 = vmatprep.mubr.f32.mxu0 %v5708_v26  ;;  %4508 = vmatpush3.bf16.msra.mxu1 %v4505_v46  ;;  %v3230_v46 = vld [vmem:[%s6427_s1 + $0x438] sm:$0xff] }
  0xca   : > { %4510 = vmatprep.subr.bf16.mxu1 %v4509_v24 }
  0xcb   : > { %3882 = vmatmul.mubr.f32.gmra.mrb[8].mxu1 %v6566_v17 }
  0xcc   : > { %4226 = vmatmul.mubr.f32.gmra.mrb[24].mxu0 %v5711_v58  ;;  %3884 = vmatprep.mubr.f32.mxu1 %v6567_v52 }
  0xcd   : > { %4228 = vmatprep.mubr.f32.mxu0 %v5745_v13  ;;  %4512 = vmatpush3.bf16.msra.mxu1 %v4509_v24  ;;  %v3231_v24 = vld [vmem:[%s6427_s1 + $0x440] sm:$0xff] }
  0xce   : > { %4514 = vmatprep.subr.bf16.mxu1 %v4513_v50  ;;  %v4669_v51 = vpack.c.bf16 %v3232_v32, %v3231_v24  ;;  %v6588_v24 = vld [vmem:[#allocation32_spill] sm:$0xff]  ;;  %v4984_v32 = vld [vmem:[%s5114_s18 + $0x18] sm:$0xff] }
  0xcf   : > { %3885 = vmatmul.mubr.f32.gmra.mrb[10].mxu1 %v6568_v27 }
  0xd0   : > { %4229 = vmatmul.mubr.f32.gmra.mrb[26].mxu0 %v5748_v40  ;;  %3887 = vmatprep.mubr.f32.mxu1 %v5740_v21 }
  0xd1   : > { %4231 = vmatprep.mubr.f32.mxu0 %v5929_v62  ;;  %4516 = vmatpush3.bf16.msra.mxu1 %v4513_v50  ;;  %v6577_v50 = vld [vmem:[#allocation22_spill] sm:$0xff] }
  0xd2   : > { %4518 = vmatprep.subr.bf16.mxu1 %v4517_v6 }
  0xd3   : > { %3888 = vmatmul.mubr.f32.gmra.mrb[12].mxu1 %v6569_v31 }
  0xd4   : > { %4232 = vmatmul.mubr.f32.gmra.mrb[28].mxu0 %v5933_v42  ;;  %3890 = vmatprep.mubr.f32.mxu1 %v5777_v12 }
  0xd5   : > { %4234 = vmatprep.mubr.f32.mxu0 %v6148_v53  ;;  %4520 = vmatpush3.bf16.msra.mxu1 %v4517_v6  ;;  %v3234_v6 = vld [vmem:[%s6427_s1 + $0x458] sm:$0xff] }
  0xd6   : > { %4522 = vmatprep.subr.bf16.mxu1 %v4521_v39 }
  0xd7   : > { %3891 = vmatmul.mubr.f32.gmra.mrb[14].mxu1 %v5796_v44 }
  0xd8   : > { %4235 = vmatmul.mubr.f32.gmra.mrb[30].mxu0 %v6155_v28  ;;  %3893 = vmatprep.mubr.f32.mxu1 %v5803_v20 }
  0xd9   : > { %4269 = vmatprep.mubr.f32.mxu0 %v6570_v9  ;;  %4524 = vmatpush3.bf16.msra.mxu1 %v4521_v39  ;;  %v4673_v39 = vpack.c.bf16 %v3234_v6, %v3233_v5  ;;  %v6580_v9 = vld [vmem:[#allocation25_spill] sm:$0xff]  ;;  %v6591_v6 = vld [vmem:[#allocation38_spill] sm:$0xff] }
  0xda   : > { %4685 = vmatprep.subr.bf16.mxu1 %v6571_v1  ;;  %v4986_v5 = vld [vmem:[%s5114_s18 + $0x30] sm:$0xff] }
  0xdb   : > { %3894 = vmatmul.mubr.f32.gmra.mrb[16].mxu1 %v5821_v7 }
  0xdc   : > { %4270 = vmatmul.mubr.f32.vlgmr.msra.gmra.mrb[0].mxu0 %v6572_v45  ;;  %3896 = vmatprep.mubr.f32.mxu1 %v5825_v34  ;;  %v3237_v45 = vld [vmem:[%s6427_s1 + $0x470] sm:$0xff] }
  0xdd   : > { %4656 = vmatpush3.bf16.msra.mxu0 %v6074_v30  ;;  %4272 = vmatprep.mubr.f32.mxu0 %v6573_v59  ;;  %v4665_v30 = vpack.c.bf16 %v3230_v46, %v3229_v15  ;;  %v3238_v59 = vld [vmem:[%s6427_s1 + $0x478] sm:$0xff]  ;;  %v6584_v15 = vld [vmem:[#allocation28_spill] sm:$0xff] }
  0xde   : > { %4658 = vmatprep.subr.bf16.mxu0 %v4657_v60  ;;  %v4681_v46 = vpack.c.bf16 %v3238_v59, %v3237_v45  ;;  %v6597_v45 = vld [vmem:[#allocation46_spill] sm:$0xff]  ;;  %v6598_v59 = vld [vmem:[#allocation11_spill] sm:$0xff] }
  0xdf   : > { %3897 = vmatmul.mubr.f32.gmra.mrb[18].mxu1 %v5842_v38 }
  0xe0   : > { %4273 = vmatmul.mubr.f32.gmra.mrb[2].mxu0 %v6574_v49  ;;  %3899 = vmatprep.mubr.f32.mxu1 %v5846_v54  ;;  %v6585_v49 = vld [vmem:[#allocation29_spill] sm:$0xff] }
  0xe1   : > { %4275 = vmatprep.mubr.f32.mxu0 %v6575_v22  ;;  %4660 = vmatpush3.bf16.msra.mxu0 %v4657_v60  ;;  %v6581_v60 = vld [vmem:[#allocation26_spill] sm:$0xff] }
  0xe2   : > { %4662 = vmatprep.subr.bf16.mxu0 %v4661_v11  ;;  %v6586_v22 = vld [vmem:[#allocation54_spill] sm:$0xff] }
  0xe3   : > { %3900 = vmatmul.mubr.f32.gmra.mrb[20].mxu1 %v5863_v37 }
  0xe4   : > { %4276 = vmatmul.mubr.f32.gmra.mrb[4].mxu0 %v6576_v36  ;;  %3902 = vmatprep.mubr.f32.mxu1 %v5867_v25  ;;  %v6589_v36 = vld [vmem:[#allocation34_spill] sm:$0xff] }
  0xe5   : > { %4278 = vmatprep.mubr.f32.mxu0 %v6577_v50  ;;  %4664 = vmatpush3.bf16.msra.mxu0 %v4661_v11  ;;  %v6583_v11 = vld [vmem:[#allocation27_spill] sm:$0xff] }
  0xe6   : > { %4666 = vmatprep.subr.bf16.mxu0 %v4665_v30  ;;  %v4985_v50 = vld [vmem:[%s5114_s18 + $0x20] sm:$0xff] }
  0xe7   : > { %3903 = vmatmul.mubr.f32.gmra.mrb[22].mxu1 %v5882_v41 }
  0xe8   : > { %4279 = vmatmul.mubr.f32.gmra.mrb[6].mxu0 %v6578_v16  ;;  %3905 = vmatprep.mubr.f32.mxu1 %v5886_v61  ;;  %v6592_v16 = vld [vmem:[#allocation9_spill] sm:$0xff] }
  0xe9   : > { %4281 = vmatprep.mubr.f32.mxu0 %v6579_v8  ;;  %4668 = vmatpush3.bf16.msra.mxu0 %v4665_v30  ;;  %v6587_v30 = vld [vmem:[#allocation30_spill] sm:$0xff] }
  0xea   : > { %4670 = vmatprep.subr.bf16.mxu0 %v4669_v51  ;;  %v4987_v8 = vld [vmem:[%s5114_s18 + $0x38] sm:$0xff] }
  0xeb   : > { %3906 = vmatmul.mubr.f32.gmra.mrb[24].mxu1 %v5901_v56 }
  0xec   : > { %4282 = vmatmul.mubr.f32.gmra.mrb[8].mxu0 %v6580_v9  ;;  %3908 = vmatprep.mubr.f32.mxu1 %v5905_v29  ;;  %v4989_v9 = vld [vmem:[%s5114_s18 + $0x50] sm:$0xff] }
  0xed   : > { %4284 = vmatprep.mubr.f32.mxu0 %v6581_v60  ;;  %4672 = vmatpush3.bf16.msra.mxu0 %v4669_v51  ;;  %v6590_v51 = vld [vmem:[#allocation36_spill] sm:$0xff] }
  0xee   : > { %4674 = vmatprep.subr.bf16.mxu0 %v4673_v39  ;;  %v6596_v60 = vld [vmem:[#allocation44_spill] sm:$0xff] }
  0xef   : > { %3909 = vmatmul.mubr.f32.gmra.mrb[26].mxu1 %v6582_v14 }
  0xf0   : > { %4285 = vmatmul.mubr.f32.gmra.mrb[10].mxu0 %v6583_v11  ;;  %3911 = vmatprep.mubr.f32.mxu1 %v5924_v55  ;;  %v4991_v11 = vld [vmem:[%s5114_s18 + $0x68] sm:$0xff] }
  0xf1   : > { %4287 = vmatprep.mubr.f32.mxu0 %v6584_v15  ;;  %4676 = vmatpush3.bf16.msra.mxu0 %v4673_v39  ;;  %v6593_v39 = vld [vmem:[#allocation40_spill] sm:$0xff]  ;;  %v6599_v15 = vld [vmem:[#allocation47_spill] sm:$0xff] }
  0xf2   : > { %4678 = vmatprep.subr.bf16.mxu0 %v4677_v3 }
  0xf3   : > { %3912 = vmatmul.mubr.f32.gmra.mrb[28].mxu1 %v5945_v48 }
  0xf4   : > { %4288 = vmatmul.mubr.f32.gmra.mrb[12].mxu0 %v6585_v49  ;;  %3914 = vmatprep.mubr.f32.mxu1 %v6586_v22  ;;  %v6600_v49 = vld [vmem:[#allocation49_spill] sm:$0xff] }
  0xf5   : > { %4290 = vmatprep.mubr.f32.mxu0 %v6587_v30  ;;  %4680 = vmatpush3.bf16.msra.mxu0 %v4677_v3  ;;  %v4990_v3 = vld [vmem:[%s5114_s18 + $0x60] sm:$0xff] }
  0xf6   : > { %4682 = vmatprep.subr.bf16.mxu0 %v4681_v46 }
  0xf7   : > { %3915 = vmatmul.mubr.f32.gmra.mrb[30].mxu1 %v5967_v23 }
  0xf8   : > { %4291 = vmatmul.mubr.f32.gmra.mrb[14].mxu0 %v6588_v24  ;;  %3949 = vmatprep.mubr.f32.mxu1 %v4984_v32  ;;  %v1524_v32 = vrot.slane %v5929_v62, 1 }
  0xf9   : > { %4293 = vmatprep.mubr.f32.mxu0 %v6589_v36  ;;  %4684 = vmatpush3.bf16.msra.mxu0 %v4681_v46  ;;  %v4992_v46 = vld [vmem:[%s5114_s18 + $0x78] sm:$0xff] }
  0xfb   : > { %3950 = vmatmul.mubr.f32.vlgmr.msra.gmra.mrb[0].mxu1 %v4985_v50  ;;  %v1525_v50 = vrot.slane %v5933_v42, 1 }
  0xfc   : > { %4294 = vmatmul.mubr.f32.gmra.mrb[16].mxu0 %v6590_v51  ;;  %4693 = vmatpush3.bf16.msra.mxu1 %v6571_v1  ;;  %v6595_v1 = vld [vmem:[#allocation10_spill] sm:$0xff] }
  0xfd   : > { %3952 = vmatprep.mubr.f32.mxu1 %v4986_v5  ;;  %4296 = vmatprep.mubr.f32.mxu0 %v6591_v6  ;;  %v6601_v5 = vld [vmem:[#allocation12_spill] sm:$0xff] }
  0xfe   : > { %4686 = vmatprep.subr.bf16.mxu1 %v6592_v16 }
  0xff   : > { %3953 = vmatmul.mubr.f32.gmra.mrb[2].mxu1 %v4987_v8  ;;  %v6602_v8 = vld [vmem:[#allocation50_spill] sm:$0xff] }
 0x100   : > { %4297 = vmatmul.mubr.f32.gmra.mrb[18].mxu0 %v6593_v39  ;;  %3955 = vmatprep.mubr.f32.mxu1 %v4988_v2  ;;  %v4994_v2 = vld [vmem:[%s5114_s18 + $0x90] sm:$0xff] }
 0x101   : > { %4299 = vmatprep.mubr.f32.mxu0 %v6594_v57  ;;  %4694 = vmatpush3.bf16.msra.mxu1 %v6592_v16  ;;  %v4993_v16 = vld [vmem:[%s5114_s18 + $0x80] sm:$0xff] }
 0x102   : > { %4687 = vmatprep.subr.bf16.mxu1 %v6595_v1 }
 0x103   : > { %3956 = vmatmul.mubr.f32.gmra.mrb[4].mxu1 %v4989_v9  ;;  %v1527_v9 = vrot.slane %v5954_v0, 1  ;;  %v4996_v0 = vld [vmem:[%s5114_s18 + $0xa8] sm:$0xff] }
 0x104   : > { %4300 = vmatmul.mubr.f32.gmra.mrb[20].mxu0 %v6596_v60  ;;  %3958 = vmatprep.mubr.f32.mxu1 %v4990_v3  ;;  %v2363_v3 = vrot.slane %v6148_v53, 1 }
 0x105   : > { %4302 = vmatprep.mubr.f32.mxu0 %v6597_v45  ;;  %4695 = vmatpush3.bf16.msra.mxu1 %v6595_v1  ;;  %v6603_v1 = vld [vmem:[#allocation51_spill] sm:$0xff] }
 0x106   : > { %4688 = vmatprep.subr.bf16.mxu1 %v6598_v59 }
 0x107   : > { %3959 = vmatmul.mubr.f32.gmra.mrb[6].mxu1 %v4991_v11  ;;  %v6272_v11 = vsel %vm280_vm0, %v1524_v32, %v1525_v50 }
 0x108   : > { %4303 = vmatmul.mubr.f32.gmra.mrb[22].mxu0 %v6599_v15  ;;  %3961 = vmatprep.mubr.f32.mxu1 %v4992_v46  ;;  %v6275_v46 = vld [vmem:[%s5114_s18 + $0x1a8] sm:$0x3] }
 0x109   : > { %4305 = vmatprep.mubr.f32.mxu0 %v6600_v49  ;;  %4696 = vmatpush3.bf16.msra.mxu1 %v6598_v59  ;;  %v2364_v59 = vrot.slane %v6155_v28, 1  ;;  %v2366_v32 = vrot.slane %v6275_v46, 1 }
 0x10a   : > { %4689 = vmatprep.subr.bf16.mxu1 %v6601_v5 }
 0x10b   : > { %3962 = vmatmul.mubr.f32.gmra.mrb[8].mxu1 %v4993_v16  ;;  %v6604_v16 = vld [vmem:[#allocation13_spill] sm:$0xff]  ;;  %v2365_v33 = vsel %vm280_vm0, %v2363_v3, %v2364_v59  ;;  %v5000_v3 = vld [vmem:[%s5114_s18 + $0xd8] sm:$0xff] }
 0x10c   : > { %4306 = vmatmul.mubr.f32.gmra.mrb[24].mxu0 %v6602_v8  ;;  %3964 = vmatprep.mubr.f32.mxu1 %v4994_v2  ;;  %v4995_v2 = vld [vmem:[%s5114_s18 + $0x98] sm:$0xff] }
 0x10d   : > { %4308 = vmatprep.mubr.f32.mxu0 %v6603_v1  ;;  %4697 = vmatpush3.bf16.msra.mxu1 %v6601_v5  ;;  %v6283_v5 = vsel %vm280_vm0, %v1525_v50, %v1527_v9  ;;  %v6606_v1 = vld [vmem:[#allocation14_spill] sm:$0xff]  ;;  %v2367_v50 = vsel %vm280_vm0, %v2364_v59, %v2366_v32  ;;  %v6607_v9 = vld [vmem:[#allocation15_spill] sm:$0xff]  ;;  %v5004_v32 = vld [vmem:[%s5114_s18 + $0x108] sm:$0xff] }
 0x10e   : > { %4690 = vmatprep.subr.bf16.mxu1 %v6604_v16  ;;  %v5003_v59 = vld [vmem:[%s5114_s18 + $0xf8] sm:$0xff] }
 0x10f   : > { %3965 = vmatmul.mubr.f32.gmra.mrb[10].mxu1 %v4995_v2  ;;  %v4997_v2 = vld [vmem:[%s5114_s18 + $0xb0] sm:$0xff] }
 0x110   : > { %4309 = vmatmul.mubr.f32.gmra.mrb[26].mxu0 %v6605_v43  ;;  %3967 = vmatprep.mubr.f32.mxu1 %v4996_v0  ;;  %v4998_v0 = vld [vmem:[%s5114_s18 + $0xc0] sm:$0xff] }
 0x111   : > { %4311 = vmatprep.mubr.f32.mxu0 %v6272_v11  ;;  %4698 = vmatpush3.bf16.msra.mxu1 %v6604_v16  ;;  %v4999_v16 = vld [vmem:[%s5114_s18 + $0xc8] sm:$0xff] }
 0x112   : > { %4691 = vmatprep.subr.bf16.mxu1 %v6606_v1 }
 0x113   : > { %3968 = vmatmul.mubr.f32.gmra.mrb[12].mxu1 %v4997_v2  ;;  %v5006_v2 = vld [vmem:[%s5114_s18 + $0x120] sm:$0xff] }
 0x114   : > { %4312 = vmatmul.mubr.f32.gmra.mrb[28].mxu0 %v6283_v5  ;;  %3970 = vmatprep.mubr.f32.mxu1 %v4998_v0 }
 0x115   : > { %4314 = vmatprep.mubr.f32.mxu0 %v2365_v33  ;;  %4699 = vmatpush3.bf16.msra.mxu1 %v6606_v1  ;;  %v5001_v33 = vld [vmem:[%s5114_s18 + $0xe0] sm:$0xff]  ;;  %v5002_v1 = vld [vmem:[%s5114_s18 + $0xf0] sm:$0xff] }
 0x116   : > { %4692 = vmatprep.subr.bf16.mxu1 %v6607_v9 }
 0x117   : > { %3971 = vmatmul.mubr.f32.gmra.mrb[14].mxu1 %v4999_v16 }
 0x118   : > { %4315 = vmatmul.mubr.f32.gmra.mrb[30].mxu0 %v2367_v50  ;;  %3973 = vmatprep.mubr.f32.mxu1 %v5000_v3 }
 0x119   : > { %4349 = vmatprep.mubr.f32.mxu0 %v6561_v18  ;;  %4700 = vmatpush3.bf16.msra.mxu1 %v6607_v9  ;;  %v5005_v18 = vld [vmem:[%s5114_s18 + $0x110] sm:$0xff] }
 0x11b   : > { %3974 = vmatmul.mubr.f32.gmra.mrb[16].mxu1 %v5001_v33 }
 0x11c   : > { %4350 = vmatmul.mubr.f32.vlgmr.msra.gmra.mrb[0].mxu0 %v6562_v63  ;;  %3976 = vmatprep.mubr.f32.mxu1 %v5002_v1  ;;  %v5007_v63 = vld [vmem:[%s5114_s18 + $0x128] sm:$0xff]  ;;  %s5077_s18 = smov [#allocation2]  }
 0x11d   : > { %4352 = vmatprep.mubr.f32.mxu0 %v6563_v19  ;;  %s3044_s19 = sshll.u32 %s5077_s18, 4  ;;  %s3045_s19 = int_to_ptr.vmem [resolvable:$true] %s3044_s19 }
 0x11e   : > { %s5008_s22 = scalar_lea.vmem %s3045_s19, 16  ;;  %s5014_s23 = scalar_lea.vmem %s3045_s19, 32 }
 0x11f   : > { %3977 = vmatmul.mubr.f32.gmra.mrb[18].mxu1 %v5003_v59  ;;  %p5009_p6 = scmp.ne.s32.totalorder %s3045_s19, %s5008_s22  ;;  %p5015_p9 = scmp.lt.s32.totalorder %s3045_s19, %s3045_s19 }
 0x120   : > { %4353 = vmatmul.mubr.f32.gmra.mrb[2].mxu0 %v6564_v35  ;;  %3979 = vmatprep.mubr.f32.mxu1 %v5004_v32  ;;  %p5016_p10 = scmp.lt.s32.totalorder %s5014_s23, %s5008_s22 }
 0x121   : > { %4355 = vmatprep.mubr.f32.mxu0 %v6565_v47  ;;  %p5010_p7 = pnand %p5009_p6, %p4966_p5 }
 0x122   : > { %p5017_p11 = por %p5016_p10, %p5015_p9 }
 0x123   : > { %3980 = vmatmul.mubr.f32.gmra.mrb[20].mxu1 %v5005_v18  ;;  %p5011_p8 = pneg %p5010_p7 }
 0x124   : > { %4356 = vmatmul.mubr.f32.gmra.mrb[4].mxu0 %v6566_v17  ;;  %3982 = vmatprep.mubr.f32.mxu1 %v5006_v2 }
 0x125   : > { %4358 = vmatprep.mubr.f32.mxu0 %v6567_v52  ;;  %p5018_p12 = pnand %p5017_p11, %p5011_p8 }
 0x127   : > { %3983 = vmatmul.mubr.f32.gmra.mrb[22].mxu1 %v5007_v63 }
 0x128   : > { %4359 = vmatmul.mubr.f32.gmra.mrb[6].mxu0 %v6568_v27  ;;  %3985 = vmatprep.mubr.f32.mxu1 %v5671_v4  ;;  %v2645_v4 = vrot.slane %v6155_v28, 2 }
 0x129   : > { %4361 = vmatprep.mubr.f32.mxu0 %v5740_v21  ;;  %v6610_v21 = vld [vmem:[#allocation56_spill] sm:$0xff] }
 0x12b   : > { %3986 = vmatmul.mubr.f32.gmra.mrb[24].mxu1 %v5674_v10  ;;  %v6608_v10 = vld [vmem:[#allocation51_spill] sm:$0xff] }
 0x12c   : > { %4362 = vmatmul.mubr.f32.gmra.mrb[8].mxu0 %v6569_v31  ;;  %3988 = vmatprep.mubr.f32.mxu1 %v5708_v26  ;;  %v2647_v26 = vrot.slane %v6275_v46, 2 }
 0x12d   : > { %4364 = vmatprep.mubr.f32.mxu0 %v5777_v12 }
 0x12f   : > { %3989 = vmatmul.mubr.f32.gmra.mrb[26].mxu1 %v5711_v58 }
 0x130   : > { %4365 = vmatmul.mubr.f32.gmra.mrb[10].mxu0 %v5796_v44  ;;  %3991 = vmatprep.mubr.f32.mxu1 %v5745_v13  ;;  %v6609_v13 = vld [vmem:[#allocation55_spill] sm:$0xff] }
 0x131   : > { %4367 = vmatprep.mubr.f32.mxu0 %v5803_v20  ;;  %v2644_v20 = vrot.slane %v6148_v53, 2 }
 0x133   : > { %3992 = vmatmul.mubr.f32.gmra.mrb[28].mxu1 %v5748_v40  ;;  %v2646_v58 = vsel %vm860_vm1, %v2644_v20, %v2645_v4  ;;  %v2648_v40 = vsel %vm860_vm1, %v2645_v4, %v2647_v26 }
 0x134   : > { %4368 = vmatmul.mubr.f32.gmra.mrb[12].mxu0 %v5821_v7  ;;  %3994 = vmatprep.mubr.f32.mxu1 %v5929_v62 }
 0x135   : > { %4370 = vmatprep.mubr.f32.mxu0 %v5825_v34 }
 0x137   : > { %3995 = vmatmul.mubr.f32.gmra.mrb[30].mxu1 %v5933_v42 }
 0x138   : > { %4371 = vmatmul.mubr.f32.gmra.mrb[14].mxu0 %v5842_v38  ;;  %4053 = vmatprep.mubr.f32.mxu1 %v6587_v30 }
 0x139   : > { %4373 = vmatprep.mubr.f32.mxu0 %v5846_v54 }
 0x13b   : > { %4054 = vmatmul.mubr.f32.vlgmr.msra.gmra.mrb[16].mxu1 %v6588_v24 }
 0x13c   : > { %4374 = vmatmul.mubr.f32.gmra.mrb[16].mxu0 %v5863_v37  ;;  %4056 = vmatprep.mubr.f32.mxu1 %v6589_v36 }
 0x13d   : > { %4376 = vmatprep.mubr.f32.mxu0 %v5867_v25 }
 0x13f   : > { %4057 = vmatmul.mubr.f32.gmra.mrb[18].mxu1 %v6590_v51 }
 0x140   : > { %4377 = vmatmul.mubr.f32.gmra.mrb[18].mxu0 %v5882_v41  ;;  %4059 = vmatprep.mubr.f32.mxu1 %v6591_v6 }
 0x141   : > { %4379 = vmatprep.mubr.f32.mxu0 %v5886_v61 }
 0x143   : > { %4060 = vmatmul.mubr.f32.gmra.mrb[20].mxu1 %v6593_v39 }
 0x144   : > { %4380 = vmatmul.mubr.f32.gmra.mrb[20].mxu0 %v5901_v56  ;;  %4062 = vmatprep.mubr.f32.mxu1 %v6594_v57 }
 0x145   : > { %4382 = vmatprep.mubr.f32.mxu0 %v5905_v29 }
 0x147   : > { %4063 = vmatmul.mubr.f32.gmra.mrb[22].mxu1 %v6596_v60 }
 0x148   : > { %4383 = vmatmul.mubr.f32.gmra.mrb[22].mxu0 %v6582_v14  ;;  %4065 = vmatprep.mubr.f32.mxu1 %v6597_v45 }
 0x149   : > { %4385 = vmatprep.mubr.f32.mxu0 %v5924_v55 }
 0x14b   : > { %4066 = vmatmul.mubr.f32.gmra.mrb[24].mxu1 %v6599_v15 }
 0x14c   : > { %4386 = vmatmul.mubr.f32.gmra.mrb[24].mxu0 %v5945_v48  ;;  %4068 = vmatprep.mubr.f32.mxu1 %v6600_v49 }
 0x14d   : > { %4388 = vmatprep.mubr.f32.mxu0 %v6586_v22 }
 0x14f   : > { %4069 = vmatmul.mubr.f32.gmra.mrb[26].mxu1 %v6602_v8 }
 0x150   : > { %4389 = vmatmul.mubr.f32.gmra.mrb[26].mxu0 %v5967_v23  ;;  %4071 = vmatprep.mubr.f32.mxu1 %v6608_v10 }
 0x151   : > { %4391 = vmatprep.mubr.f32.mxu0 %v6609_v13 }
 0x153   : > { %4072 = vmatmul.mubr.f32.gmra.mrb[28].mxu1 %v6605_v43 }
 0x154   : > { %4392 = vmatmul.mubr.f32.gmra.mrb[28].mxu0 %v6610_v21  ;;  %4074 = vmatprep.mubr.f32.mxu1 %v6272_v11 }
 0x155   : > { %4394 = vmatprep.mubr.f32.mxu0 %v2646_v58 }
 0x157   : > { %4075 = vmatmul.mubr.f32.gmra.mrb[30].mxu1 %v6283_v5 }
 0x158   : > { %4395 = vmatmul.mubr.f32.gmra.mrb[30].mxu0 %v2648_v40 }
 0x1ce   : > { %v3951_v12 = vpop.f32.mrb[0].mxu1 }
 0x1cf   : > { %v1330_v44 = vpop.f32.mrb[1].mxu1 }
 0x1d2   : > { %v3954_v42 = vpop.f32.mrb[2].mxu1 }
 0x1d3   : > { %v1340_v7 = vpop.f32.mrb[3].mxu1 }
 0x1d6   : > { %v3957_v34 = vpop.f32.mrb[4].mxu1 }
 0x1d7   : > { %v1350_v38 = vpop.f32.mrb[5].mxu1 }
 0x1da   : > { %v3960_v54 = vpop.f32.mrb[6].mxu1 }
 0x1db   : > { %v1360_v37 = vpop.f32.mrb[7].mxu1 }
 0x1de   : > { %v3963_v25 = vpop.f32.mrb[8].mxu1 }
 0x1df   : > { %v1370_v41 = vpop.f32.mrb[9].mxu1 }
 0x1e2   : > { %v3966_v61 = vpop.f32.mrb[10].mxu1 }
 0x1e3   : > { %v1380_v56 = vpop.f32.mrb[11].mxu1 }
 0x1e6   : > { %v3969_v29 = vpop.f32.mrb[12].mxu1 }
 0x1e7   : > { %v1390_v55 = vpop.f32.mrb[13].mxu1 }
 0x1ea   : > { %v6364_v62 = vpop.f32.mrb[14].mxu1 }
 0x1eb   : > { %v6366_v48 = vpop.f32.mrb[15].mxu1 }
 0x1ef   : > { %v4351_v23 = vpop.f32.mrb[0].mxu0 }
 0x1f0   : > { %v4701_v43 = vadd.f32 %v4351_v23, %v3951_v12  ;;  %v2734_v19 = vpop.f32.mrb[1].mxu0 }
 0x1f1   : > { %v4702_v35 = vadd.f32 %v2734_v19, %v1330_v44 }
 0x1f2   : > { %v2967_v47 = vmul.f32 %v4701_v43, %v4701_v43 }
 0x1f3   : > { %v2926_v17 = vadd.f32 %v4702_v35, %v4701_v43  ;;  %v2966_v52 = vmul.f32 %v4702_v35, %v4702_v35  ;;  %v4354_v27 = vpop.f32.mrb[2].mxu0 }
 0x1f4   : > { %v4703_v53 = vadd.f32 %v4354_v27, %v3954_v42  ;;  %v2744_v31 = vpop.f32.mrb[3].mxu0 }
 0x1f5   : > { %v2998_v28 = vadd.f32 %v2967_v47, %v2966_v52  ;;  %v4704_v14 = vadd.f32 %v2744_v31, %v1340_v7 }
 0x1f6   : > { %v2969_v6 = vmul.f32 %v4703_v53, %v4703_v53 }
 0x1f7   : > { %v2927_v22 = vadd.f32 %v4704_v14, %v2926_v17  ;;  %v2968_v30 = vmul.f32 %v4704_v14, %v4704_v14  ;;  %v4357_v24 = vpop.f32.mrb[4].mxu0 }
 0x1f8   : > { %v4705_v36 = vadd.f32 %v4357_v24, %v3957_v34  ;;  %v2754_v51 = vpop.f32.mrb[5].mxu0 }
 0x1f9   : > { %v2999_v39 = vadd.f32 %v2998_v28, %v2968_v30  ;;  %v4706_v57 = vadd.f32 %v2754_v51, %v1350_v38  ;;  %v2928_v60 = vadd.f32 %v4703_v53, %v2927_v22 }
 0x1fa   : > { %v2971_v5 = vmul.f32 %v4705_v36, %v4705_v36 }
 0x1fb   : > { %v2929_v45 = vadd.f32 %v4706_v57, %v2928_v60  ;;  %v2970_v15 = vmul.f32 %v4706_v57, %v4706_v57  ;;  %v3000_v49 = vadd.f32 %v2999_v39, %v2969_v6  ;;  %v4360_v8 = vpop.f32.mrb[6].mxu0 }
 0x1fc   : > { %v4707_v11 = vadd.f32 %v4360_v8, %v3960_v54  ;;  %v2764_v46 = vpop.f32.mrb[7].mxu0 }
 0x1fd   : > { %v3001_v0 = vadd.f32 %v3000_v49, %v2970_v15  ;;  %v4708_v50 = vadd.f32 %v2764_v46, %v1360_v37  ;;  %v2930_v9 = vadd.f32 %v4705_v36, %v2929_v45 }
 0x1fe   : > { %v2973_v18 = vmul.f32 %v4707_v11, %v4707_v11 }
 0x1ff   : > { %v2931_v16 = vadd.f32 %v4708_v50, %v2930_v9  ;;  %v2972_v3 = vmul.f32 %v4708_v50, %v4708_v50  ;;  %v3002_v33 = vadd.f32 %v3001_v0, %v2971_v5  ;;  %v4363_v1 = vpop.f32.mrb[8].mxu0 }
 0x200   : > { %v4709_v59 = vadd.f32 %v4363_v1, %v3963_v25  ;;  %v2774_v32 = vpop.f32.mrb[9].mxu0 }
 0x201   : > { %v3003_v2 = vadd.f32 %v3002_v33, %v2972_v3  ;;  %v4710_v63 = vadd.f32 %v2774_v32, %v1370_v41  ;;  %v2932_v20 = vadd.f32 %v4707_v11, %v2931_v16 }
 0x202   : > { %v2975_v40 = vmul.f32 %v4709_v59, %v4709_v59 }
 0x203   : > { %v2933_v4 = vadd.f32 %v4710_v63, %v2932_v20  ;;  %v2974_v10 = vmul.f32 %v4710_v63, %v4710_v63  ;;  %v3004_v13 = vadd.f32 %v3003_v2, %v2973_v18  ;;  %v4366_v26 = vpop.f32.mrb[10].mxu0 }
 0x204   : > { %v4711_v58 = vadd.f32 %v4366_v26, %v3966_v61  ;;  %v2784_v21 = vpop.f32.mrb[11].mxu0 }
 0x205   : > { %v3005_v12 = vadd.f32 %v3004_v13, %v2974_v10  ;;  %v4712_v44 = vadd.f32 %v2784_v21, %v1380_v56  ;;  %v2934_v42 = vadd.f32 %v4709_v59, %v2933_v4 }
 0x206   : > { %v2977_v23 = vmul.f32 %v4711_v58, %v4711_v58 }
 0x207   : > { %v2935_v7 = vadd.f32 %v4712_v44, %v2934_v42  ;;  %v2976_v34 = vmul.f32 %v4712_v44, %v4712_v44  ;;  %v3006_v38 = vadd.f32 %v3005_v12, %v2975_v40  ;;  %v4369_v54 = vpop.f32.mrb[12].mxu0 }
 0x208   : > { %v4713_v37 = vadd.f32 %v4369_v54, %v3969_v29  ;;  %v2794_v25 = vpop.f32.mrb[13].mxu0 }
 0x209   : > { %v3007_v43 = vadd.f32 %v3006_v38, %v2976_v34  ;;  %v4714_v41 = vadd.f32 %v2794_v25, %v1390_v55  ;;  %v2936_v19 = vadd.f32 %v4711_v58, %v2935_v7 }
 0x20a   : > { %v2979_v53 = vmul.f32 %v4713_v37, %v4713_v37 }
 0x20b   : > { %v2937_v35 = vadd.f32 %v4714_v41, %v2936_v19  ;;  %v2978_v47 = vmul.f32 %v4714_v41, %v4714_v41  ;;  %v3008_v17 = vadd.f32 %v3007_v43, %v2977_v23  ;;  %v4372_v52 = vpop.f32.mrb[14].mxu0 }
 0x20c   : > { %v4715_v61 = vadd.f32 %v4372_v52, %v6364_v62  ;;  %v2804_v27 = vpop.f32.mrb[15].mxu0 }
 0x20d   : > { %v3009_v56 = vadd.f32 %v3008_v17, %v2978_v47  ;;  %v4716_v31 = vadd.f32 %v2804_v27, %v6366_v48  ;;  %v2938_v28 = vadd.f32 %v4713_v37, %v2937_v35 }
 0x20e   : > { %v4055_v14 = vpop.f32.mrb[16].mxu1  ;;  %v2981_v6 = vmul.f32 %v4715_v61, %v4715_v61 }
 0x20f   : > { %v2939_v22 = vadd.f32 %v4716_v31, %v2938_v28  ;;  %v2980_v29 = vmul.f32 %v4716_v31, %v4716_v31  ;;  %v3010_v30 = vadd.f32 %v3009_v56, %v2979_v53  ;;  %v4375_v24 = vpop.f32.mrb[16].mxu0  ;;  %v1694_v36 = vpop.f32.mrb[17].mxu1 }
 0x210   : > { %v4717_v55 = vadd.f32 %v4375_v24, %v4055_v14  ;;  %v2814_v51 = vpop.f32.mrb[17].mxu0 }
 0x211   : > { %v3011_v39 = vadd.f32 %v3010_v30, %v2980_v29  ;;  %v4718_v57 = vadd.f32 %v2814_v51, %v1694_v36  ;;  %v2940_v60 = vadd.f32 %v4715_v61, %v2939_v22 }
 0x212   : > { %v4058_v45 = vpop.f32.mrb[18].mxu1  ;;  %v2983_v5 = vmul.f32 %v4717_v55, %v4717_v55 }
 0x213   : > { %v2941_v62 = vadd.f32 %v4718_v57, %v2940_v60  ;;  %v2982_v15 = vmul.f32 %v4718_v57, %v4718_v57  ;;  %v3012_v49 = vadd.f32 %v3011_v39, %v2981_v6  ;;  %v4378_v8 = vpop.f32.mrb[18].mxu0  ;;  %v1704_v11 = vpop.f32.mrb[19].mxu1 }
 0x214   : > { %v4719_v48 = vadd.f32 %v4378_v8, %v4058_v45  ;;  %v2824_v46 = vpop.f32.mrb[19].mxu0 }
 0x215   : > { %v3013_v0 = vadd.f32 %v3012_v49, %v2982_v15  ;;  %v4720_v50 = vadd.f32 %v2824_v46, %v1704_v11  ;;  %v2942_v9 = vadd.f32 %v4717_v55, %v2941_v62 }
 0x216   : > { %v4061_v16 = vpop.f32.mrb[20].mxu1  ;;  %v2985_v63 = vmul.f32 %v4719_v48, %v4719_v48 }
 0x217   : > { %v2943_v3 = vadd.f32 %v4720_v50, %v2942_v9  ;;  %v2984_v33 = vmul.f32 %v4720_v50, %v4720_v50  ;;  %v3014_v1 = vadd.f32 %v3013_v0, %v2983_v5  ;;  %v4381_v59 = vpop.f32.mrb[20].mxu0  ;;  %v1714_v32 = vpop.f32.mrb[21].mxu1 }
 0x218   : > { %v4721_v18 = vadd.f32 %v4381_v59, %v4061_v16  ;;  %v2834_v2 = vpop.f32.mrb[21].mxu0 }
 0x219   : > { %v3015_v20 = vadd.f32 %v3014_v1, %v2984_v33  ;;  %v4722_v4 = vadd.f32 %v2834_v2, %v1714_v32  ;;  %v2944_v10 = vadd.f32 %v4719_v48, %v2943_v3 }
 0x21a   : > { %v4064_v13 = vpop.f32.mrb[22].mxu1  ;;  %v2987_v7 = vmul.f32 %v4721_v18, %v4721_v18 }
 0x21b   : > { %v2945_v26 = vadd.f32 %v4722_v4, %v2944_v10  ;;  %v2986_v58 = vmul.f32 %v4722_v4, %v4722_v4  ;;  %v3016_v21 = vadd.f32 %v3015_v20, %v2985_v63  ;;  %v4384_v40 = vpop.f32.mrb[22].mxu0  ;;  %v1724_v12 = vpop.f32.mrb[23].mxu1 }
 0x21c   : > { %v4723_v44 = vadd.f32 %v4384_v40, %v4064_v13  ;;  %v2844_v42 = vpop.f32.mrb[23].mxu0 }
 0x21d   : > { %v3017_v34 = vadd.f32 %v3016_v21, %v2986_v58  ;;  %v4724_v38 = vadd.f32 %v2844_v42, %v1724_v12  ;;  %v2946_v54 = vadd.f32 %v4721_v18, %v2945_v26 }
 0x21e   : > { %v4067_v37 = vpop.f32.mrb[24].mxu1  ;;  %v2989_v17 = vmul.f32 %v4723_v44, %v4723_v44 }
 0x21f   : > { %v2947_v25 = vadd.f32 %v4724_v38, %v2946_v54  ;;  %v2988_v23 = vmul.f32 %v4724_v38, %v4724_v38  ;;  %v3018_v43 = vadd.f32 %v3017_v34, %v2987_v7  ;;  %v4387_v41 = vpop.f32.mrb[24].mxu0  ;;  %v1734_v19 = vpop.f32.mrb[25].mxu1 }
 0x220   : > { %v4725_v35 = vadd.f32 %v4387_v41, %v4067_v37  ;;  %v2854_v47 = vpop.f32.mrb[25].mxu0  ;;  %v2925_v37 = vld [vmem:[#allocation2] sm:$0x1] }
 0x221   : > { %v3019_v52 = vadd.f32 %v3018_v43, %v2988_v23  ;;  %v4726_v61 = vadd.f32 %v2854_v47, %v1734_v19  ;;  %v2948_v27 = vadd.f32 %v4723_v44, %v2947_v25  ;;  %v2965_v43 = vld [vmem:[#allocation4] sm:$0x1] }
 0x222   : > { %v4070_v53 = vpop.f32.mrb[26].mxu1  ;;  %v2991_v24 = vmul.f32 %v4725_v35, %v4725_v35 }
 0x223   : > { %v2949_v56 = vadd.f32 %v4726_v61, %v2948_v27  ;;  %v2990_v31 = vmul.f32 %v4726_v61, %v4726_v61  ;;  %v3020_v28 = vadd.f32 %v3019_v52, %v2989_v17  ;;  %v4390_v14 = vpop.f32.mrb[26].mxu0  ;;  %v1744_v22 = vpop.f32.mrb[27].mxu1 }
 0x224   : > { %v4727_v29 = vadd.f32 %v4390_v14, %v4070_v53  ;;  %v2864_v30 = vpop.f32.mrb[27].mxu0 }
 0x225   : > { %v3021_v36 = vadd.f32 %v3020_v28, %v2990_v31  ;;  %v4728_v55 = vadd.f32 %v2864_v30, %v1744_v22  ;;  %v2950_v51 = vadd.f32 %v4725_v35, %v2949_v56 }
 0x226   : > { %v4073_v6 = vpop.f32.mrb[28].mxu1  ;;  %v2993_v8 = vmul.f32 %v4727_v29, %v4727_v29 }
 0x227   : > { %v2951_v39 = vadd.f32 %v4728_v55, %v2950_v51  ;;  %v2992_v57 = vmul.f32 %v4728_v55, %v4728_v55  ;;  %v3022_v60 = vadd.f32 %v3021_v36, %v2991_v24  ;;  %v4393_v45 = vpop.f32.mrb[28].mxu0  ;;  %v1754_v62 = vpop.f32.mrb[29].mxu1 }
 0x228   : > { %v4729_v15 = vadd.f32 %v4393_v45, %v4073_v6  ;;  %v2874_v49 = vpop.f32.mrb[29].mxu0 }
 0x229   : > { %v3023_v11 = vadd.f32 %v3022_v60, %v2992_v57  ;;  %v4730_v48 = vadd.f32 %v2874_v49, %v1754_v62  ;;  %v2952_v46 = vadd.f32 %v4727_v29, %v2951_v39 }
 0x22a   : > { %v4076_v5 = vpop.f32.mrb[30].mxu1  ;;  %v2995_v59 = vmul.f32 %v4729_v15, %v4729_v15 }
 0x22b   : > { %v2953_v0 = vadd.f32 %v4730_v48, %v2952_v46  ;;  %v2994_v50 = vmul.f32 %v4730_v48, %v4730_v48  ;;  %v3024_v9 = vadd.f32 %v3023_v11, %v2993_v8  ;;  %v4396_v16 = vpop.f32.mrb[30].mxu0  ;;  %v1764_v3 = vpop.f32.mrb[31].mxu1 }
 0x22c   : > { %v4731_v33 = vadd.f32 %v4396_v16, %v4076_v5  ;;  %v2884_v1 = vpop.f32.mrb[31].mxu0 }
 0x22d   : > { %v3025_v32 = vadd.f32 %v3024_v9, %v2994_v50  ;;  %v4732_v18 = vadd.f32 %v2884_v1, %v1764_v3  ;;  %v2954_v2 = vadd.f32 %v4729_v15, %v2953_v0 }
 0x22e   : > { %v2997_v10 = vmul.f32 %v4731_v33, %v4731_v33 }
 0x22f   : > { %v2955_v63 = vadd.f32 %v4732_v18, %v2954_v2  ;;  %v2996_v20 = vmul.f32 %v4732_v18, %v4732_v18  ;;  %v3026_v4 = vadd.f32 %v3025_v32, %v2995_v59 }
 0x231   : > { %v2956_v13 = vadd.f32 %v4731_v33, %v2955_v63  ;;  %v3027_v26 = vadd.f32 %v3026_v4, %v2996_v20 }
 0x233   : > { %v2957_v58 = vrot.slane %v2956_v13, 4  ;;  %v3028_v21 = vadd.f32 %v3027_v26, %v2997_v10 }
 0x235   : > { %v2958_v40 = vadd.f32 %v2957_v58, %v2956_v13  ;;  %v3029_v12 = vrot.slane %v3028_v21, 4 }
 0x237   : > { %v2959_v44 = vrot.slane %v2958_v40, 2  ;;  %v3030_v42 = vadd.f32 %v3029_v12, %v3028_v21 }
 0x239   : > { %v2960_v7 = vadd.f32 %v2959_v44, %v2958_v40  ;;  %v3031_v34 = vrot.slane %v3030_v42, 2 }
 0x23b   : > { %v2961_v38 = vrot.slane %v2960_v7, 1  ;;  %v3032_v54 = vadd.f32 %v3031_v34, %v3030_v42 }
 0x23d   : > { %v2962_v25 = vadd.f32 %v2961_v38, %v2960_v7  ;;  %v3033_v23 = vrot.slane %v3032_v54, 1 }
 0x23f   : > { %v2963_v41 = vadd.f32 %v2962_v25, %v2925_v37  ;;  %v3034_v19 = vadd.f32 %v3033_v23, %v3032_v54 }
 0x241   : > { %2964 = vst [vmem:[#allocation2] sm:$0x1] %v2963_v41  ;;  %v3035_v35 = vadd.f32 %v3034_v19, %v2965_v43 }
 0x242   : > { %5021 = shalt.err (!%p5018_p12)
}
 0x243   : > { %s5022_s26 = scalar_lea.hbm %s6428_s2, 16 }
 0x244   : > { %p5023_p13 = scmp.ne.s32.totalorder %s6428_s2, %s5022_s26  ;;  %p5028_p2 = scmp.lt.u32.totalorder %s5022_s26, %s6428_s2 }
 0x246   : > { %p5024_p0 = pnand %p5023_p13, %p4966_p5 }
 0x248   : > { %p5025_p1 = pneg %p5024_p0 }
 0x24a   : > { %p5030_p3 = pnand %p5028_p2, %p5025_p1 }
 0x24c   : > { %5033 = shalt.err (!%p5030_p3)
}
 0x24d   : > { %4959 = dma.vmem_to_hbm [thread:$0]  (%p4966_p5), %s3045_s19, 16, %s6428_s2, [#allocation3]   ;;  %3036 = vst [vmem:[#allocation4] sm:$0x1] %v3035_v35 }
 0x24e   : > { %s5034_s6 = scalar_lea.vmem %s6371_s21, 16  ;;  %s5040_s7 = scalar_lea.vmem %s6371_s21, 32 }
 0x24f   : > { %p5035_p4 = scmp.ne.s32.totalorder %s6371_s21, %s5034_s6  ;;  %p5041_p8 = scmp.lt.s32.totalorder %s6371_s21, %s6371_s21 }
 0x250   : > { %p5042_p9 = scmp.lt.s32.totalorder %s5040_s7, %s5034_s6 }
 0x251   : > { %p5036_p6 = pnand %p5035_p4, %p4966_p5 }
 0x252   : > { %p5043_p10 = por %p5042_p9, %p5041_p8 }
 0x253   : > { %p5037_p7 = pneg %p5036_p6 }
 0x255   : > { %p5044_p11 = pnand %p5043_p10, %p5037_p7 }
 0x257   : > { %5047 = shalt.err (!%p5044_p11)
}
 0x258   : > { %s5048_s10 = scalar_lea.hbm %s6429_s3, 16 }
 0x259   : > { %p5049_p12 = scmp.ne.s32.totalorder %s6429_s3, %s5048_s10  ;;  %p5054_p1 = scmp.lt.u32.totalorder %s5048_s10, %s6429_s3 }
 0x25b   : > { %p5050_p13 = pnand %p5049_p12, %p4966_p5 }
 0x25d   : > { %p5051_p0 = pneg %p5050_p13 }
 0x25f   : > { %p5056_p2 = pnand %p5054_p1, %p5051_p0 }
 0x261   : > { %5059 = shalt.err (!%p5056_p2)
}
 0x262   : > { %4961 = dma.vmem_to_hbm [thread:$0]  (%p4966_p5), %s6371_s21, 16, %s6429_s3, [#allocation5]  }
 0x263   : > { %5065 = dma.done.wait (%p4966_p5), [#allocation3], 16  }
 0x264   : > { %5067 = vsyncadd (%p4966_p5), [#allocation3], 4294967280 }
 0x265   : > { %5069 = dma.done.wait (%p4966_p5), [#allocation5], 16  }
 0x266   : > { %5071 = vsyncadd (%p4966_p5), [#allocation5], 4294967280 }
 0x267 PF: > { %s16_s12 = sadd.s32 1, %s5074_s12  }
 0x268   : > { %p13_p3 = scmp.ge.s32.totalorder %s16_s12, 4  }
 0x26a   :  { %15 = sbr.rel (!%p13_p3) target bundleno = 2 (0x2), region = 75 }
 0x271   :  { %3072 = vsyncpa [#allocation3], 1 }
 0x272   :  { %3074 = vsyncpa [#allocation3 + $0x1], 1 }
 0x273   :  { %3075 = vsyncpa [#allocation5], 1 }

</bundles_post_ra>
